<compile_context>
chip_gen: v5e
topology: v5e:2x2
jax: 0.10.0
libtpu: 0.0.40
codegen_flags: <defaults>
</compile_context>

<pallas_src>
import math
import jax
import jax.numpy as jnp
import numpy as np
from jax.experimental import pallas as pl
from jax.experimental.pallas import tpu as pltpu

NEG_SLOPE = 0.01      # F.leaky_relu default (matches the reference EUGATConv usage)
NEG_INF = -1e30


# ------------------------------- Pallas kernel ------------------------------ #

def _conv_layer(nf, ed_flat, mask_ds, w_cat, w_fij, attn, *, n, fe, fo):
    """One EUGATConv layer, fully VMEM/vreg resident.

    nf:      (N, Din)           node features
    ed_flat: (N*N, Ein)         dense edge features, row index = dst*N + src
    mask_ds: (Nd, Ns)           adjacency mask (1.0 where edge src->dst exists)
    w_cat:   (Din, 2*Fe+Fo)     [W_ni | W_nj | W_node] packed column-wise
    w_fij:   (Ein, Fe), attn: (1, Fe)
    returns  h_agg (Nd, Fo), f_out (Nd, Ns, Fe)
    """
    # Single packed projection -> 96-wide MXU output instead of three 32-wide matmuls.
    proj = jnp.dot(nf, w_cat, preferred_element_type=jnp.float32)          # (N, 2Fe+Fo)
    f_ni = proj[:, :fe]                       # indexed by src
    f_nj = proj[:, fe:2 * fe]                 # indexed by dst
    h_proj = proj[:, 2 * fe:2 * fe + fo]      # message projection (indexed by src)

    f_fij = jnp.dot(ed_flat, w_fij, preferred_element_type=jnp.float32)    # (N*N, Fe)
    f_sum = (f_fij.reshape(n, n, fe)
             + f_nj[:, None, :]               # dst on rows
             + f_ni[None, :, :])              # src on middle axis
    f_out = jnp.where(f_sum > 0, f_sum, NEG_SLOPE * f_sum)                 # LeakyReLU

    # Attention logits already in (dst, src) order -> softmax over the lane axis,
    # no in-kernel transposes.
    logits = jnp.sum(f_out * attn, axis=-1)                                # (Nd, Ns)
    logits = jnp.where(mask_ds > 0.0, logits, NEG_INF)
    m = jnp.max(logits, axis=-1, keepdims=True)
    p = jnp.exp(logits - m) * mask_ds                                      # (Nd, Ns)
    denom = jnp.maximum(jnp.sum(p, axis=-1, keepdims=True), 1e-20)         # (Nd, 1)

    # Normalize AFTER the MXU aggregation: N*Fo divides instead of N*N.
    h_agg = jnp.dot(p, h_proj, preferred_element_type=jnp.float32) / denom  # (Nd, Fo)
    return h_agg, f_out


def eugatgnn_fused_kernel(nf_ref, ed_ref, mask_ref,
                          wcat1_ref, wfij1_ref, attn1_ref,
                          wcat2_ref, wfij2_ref, attn2_ref,
                          out_ref):
    n = mask_ref.shape[0]
    fe = wfij1_ref.shape[1]
    fo = wcat1_ref.shape[1] - 2 * fe

    nf = nf_ref[...]                  # (N, D)
    ed = ed_ref[...]                  # (N*N, Ein), row = dst*N + src
    mask_ds = mask_ref[...]           # (Nd, Ns)

    # ---- layer 1 ----
    h1, f1 = _conv_layer(nf, ed, mask_ds, wcat1_ref[...], wfij1_ref[...],
                         attn1_ref[...], n=n, fe=fe, fo=fo)
    # Fused dropout(identity, eval) + ReLU + residual -> no HBM round trip.
    # TODO(synk): nn.Dropout implemented as inference-mode identity (no RNG masking).
    h0 = jnp.maximum(h1, 0.0) + nf                                         # (N, D)
    ed2 = jnp.maximum(f1, 0.0).reshape(n * n, fe) + ed                     # (N*N, Fe)

    # ---- layer 2 ---- (edge output only feeds attention; never stored to HBM)
    h2, _ = _conv_layer(h0, ed2, mask_ds, wcat2_ref[...], wfij2_ref[...],
                        attn2_ref[...], n=n, fe=fe, fo=fo)
    out_ref[...] = h2 + nf


# ------------------------------- JAX wrapper -------------------------------- #

_VMEM = pl.BlockSpec(memory_space=pltpu.MemorySpace.VMEM)


def eugatgnn_forward(node_feats, edense_sd, mask_sd, batch_num_nodes, params1, params2):
    """node_feats (N, D); edense_sd (N, N, Ein) indexed [src, dst]; mask_sd (Ns, Nd)."""
    n, d = node_feats.shape
    fe = params1["w_fij"].shape[1]
    fo = params1["w_node"].shape[1]

    # Layout plumbing done ONCE in the wrapper (kills every in-kernel transpose):
    # edge tensor & mask switched to (dst, src) order; weights packed column-wise.
    ed_ds = jnp.swapaxes(edense_sd, 0, 1).reshape(n * n, d)
    mask_ds = mask_sd.T
    wcat1 = jnp.concatenate([params1["w_ni"], params1["w_nj"], params1["w_node"]], axis=1)
    wcat2 = jnp.concatenate([params2["w_ni"], params2["w_nj"], params2["w_node"]], axis=1)

    flops_layer = (2 * n * d * (2 * fe + fo)        # packed node projection
                   + 2 * n * n * d * fe             # edge projection
                   + 2 * n * n * fo                 # attention-weighted aggregation
                   + 8 * n * n * fe)                # edge update / softmax elementwise
    bytes_acc = 4 * (n * d                          # node feats in
                     + n * n * d + n * n            # edge feats + mask in
                     + 2 * (d * (2 * fe + fo) + d * fe + fe)   # weights (2 layers)
                     + n * fo)                      # node output
    cost = pl.CostEstimate(flops=2 * flops_layer,
                           transcendentals=2 * n * n,
                           bytes_accessed=bytes_acc)

    # VMEM budget: the (N*N, Fe/D) slabs pad their lane dim up to 128; allow ~a dozen
    # live copies (ed, projections, f_sum/f_out, ed2, layer-2 temporaries) plus slack,
    # floor 16 MiB, cap 48 MiB (below the smallest physical VMEM, v7x 64 MiB).
    lane = max(128, d, fe)
    need = 12 * n * n * lane * 4 + (4 << 20)
    vmem_bytes = int(min(max(need, 16 << 20), 48 << 20))

    out = pl.pallas_call(
        eugatgnn_fused_kernel,
        out_shape=jax.ShapeDtypeStruct((n, fo), jnp.float32),
        in_specs=[_VMEM] * 9,
        out_specs=_VMEM,
        compiler_params=pltpu.CompilerParams(vmem_limit_bytes=vmem_bytes),
        cost_estimate=cost,
    )(node_feats, ed_ds, mask_ds,
      wcat1, params1["w_fij"], params1["attn"],
      wcat2, params2["w_fij"], params2["attn"])

    # Readout: first node of each graph in the batch (tiny gather, plain JAX glue).
    offsets = [0]
    for c in batch_num_nodes[:-1]:
        offsets.append(offsets[-1] + int(c))
    idx = jnp.asarray(offsets, dtype=jnp.int32)
    return out[idx, :]


# --------------------------- Pure-JAX reference ------------------------------ #

def eugatgnn_reference(node_feats, edense_sd, mask_sd, batch_num_nodes, p1, p2):
    def conv(nf, ed_sd, mask, p):
        f_ni = nf @ p["w_ni"]
        f_nj = nf @ p["w_nj"]
        h_proj = nf @ p["w_node"]
        f_fij = jnp.einsum("sdf,fg->sdg", ed_sd, p["w_fij"])
        f_sum = f_fij + f_ni[:, None, :] + f_nj[None, :, :]
        f_out = jnp.where(f_sum > 0, f_sum, NEG_SLOPE * f_sum)
        e = jnp.sum(f_out * p["attn"], axis=-1)              # (Ns, Nd)
        e = jnp.where(mask > 0, e, NEG_INF)
        e = e - jnp.max(e, axis=0, keepdims=True)
        w = jnp.exp(e) * mask
        a = w / jnp.maximum(jnp.sum(w, axis=0, keepdims=True), 1e-20)
        return a.T @ h_proj, f_out

    h1, f1 = conv(node_feats, edense_sd, mask_sd, p1)
    h0 = jax.nn.relu(h1) + node_feats
    ed2 = jax.nn.relu(f1) + edense_sd
    h2, _ = conv(h0, ed2, mask_sd, p2)
    h = h2 + node_feats
    idx, num = [], 0
    for c in batch_num_nodes:
        idx.append(num)
        num += int(c)
    return h[jnp.asarray(idx, dtype=jnp.int32), :]


# ------------------------------ Param / data setup --------------------------- #

def init_conv_params(key, in_dim, edge_dim, out_dim, out_edge_dim, num_heads, stdv):
    ks = jax.random.split(key, 5)
    u = lambda k, shape: jax.random.uniform(k, shape, jnp.float32, -stdv, stdv)
    return dict(
        w_node=u(ks[0], (in_dim, num_heads * out_dim)),
        w_ni=u(ks[1], (in_dim, num_heads * out_edge_dim)),
        w_nj=u(ks[2], (in_dim, num_heads * out_edge_dim)),
        w_fij=u(ks[3], (edge_dim, num_heads * out_edge_dim)),
        attn=u(ks[4], (1, num_heads * out_edge_dim)),
    )


if __name__ == "__main__":
    in_dim = h_dim = out_dim = 32
    num_head = 1
    nodes_per_graph = [8, 8]            # g.batch_num_nodes()
    N = sum(nodes_per_graph)

    key = jax.random.PRNGKey(0)
    k_nf, k_ef, k_adj, k_p1, k_p2 = jax.random.split(key, 5)

    node_feats = jax.random.normal(k_nf, (N, in_dim), jnp.float32)

    # Block-diagonal adjacency (no cross-graph edges) with self-loops so every
    # destination has >= 1 incoming edge.
    rnd = jax.random.uniform(k_adj, (N, N))
    block = jnp.zeros((N, N), jnp.float32)
    off = 0
    for c in nodes_per_graph:
        block = block.at[off:off + c, off:off + c].set(1.0)
        off += c
    mask_sd = jnp.where((rnd < 0.5) & (block > 0), 1.0, 0.0)
    mask_sd = jnp.maximum(mask_sd, jnp.eye(N, dtype=jnp.float32))

    # Dense edge features indexed [src, dst], zero where there is no edge.
    edense_sd = jax.random.normal(k_ef, (N, N, in_dim), jnp.float32) * mask_sd[:, :, None]

    stdv = 1.0 / math.sqrt(h_dim)
    params1 = init_conv_params(k_p1, in_dim, in_dim, out_dim, out_dim, num_head, stdv)
    params2 = init_conv_params(k_p2, in_dim, in_dim, out_dim, out_dim, num_head, stdv)

    out = eugatgnn_forward(node_feats, edense_sd, mask_sd, nodes_per_graph,
                           params1, params2)
    out = jax.block_until_ready(out)
    assert out.shape == (len(nodes_per_graph), out_dim)

    ref = jax.block_until_ready(
        eugatgnn_reference(node_feats, edense_sd, mask_sd, nodes_per_graph,
                           params1, params2))
    np.testing.assert_allclose(np.asarray(out), np.asarray(ref), rtol=2e-2, atol=2e-2)

    print("KERNEL_OK")
</pallas_src>

<mosaic_0001>
module attributes {stable_mosaic.version = 11 : i64} {
  func.func @eugatgnn_fused_kernel(%arg0: memref<16x32xf32, #tpu.memory_space<vmem>>, %arg1: memref<256x32xf32, #tpu.memory_space<vmem>>, %arg2: memref<16x16xf32, #tpu.memory_space<vmem>>, %arg3: memref<32x96xf32, #tpu.memory_space<vmem>>, %arg4: memref<32x32xf32, #tpu.memory_space<vmem>>, %arg5: memref<1x32xf32, #tpu.memory_space<vmem>>, %arg6: memref<32x96xf32, #tpu.memory_space<vmem>>, %arg7: memref<32x32xf32, #tpu.memory_space<vmem>>, %arg8: memref<1x32xf32, #tpu.memory_space<vmem>>, %arg9: memref<16x32xf32, #tpu.memory_space<vmem>>) attributes {dimension_semantics = [], scalar_prefetch = 0 : i64, scratch_operands = 0 : i64, tpu.core_type = #tpu.core_type<tc>} {
    %c0 = arith.constant 0 : index
    %c0_0 = arith.constant 0 : index
    %0 = vector.load %arg0[%c0, %c0_0] : memref<16x32xf32, #tpu.memory_space<vmem>>, vector<16x32xf32>
    %c0_1 = arith.constant 0 : index
    %c0_2 = arith.constant 0 : index
    %1 = vector.load %arg1[%c0_1, %c0_2] : memref<256x32xf32, #tpu.memory_space<vmem>>, vector<256x32xf32>
    %c0_3 = arith.constant 0 : index
    %c0_4 = arith.constant 0 : index
    %2 = vector.load %arg2[%c0_3, %c0_4] : memref<16x16xf32, #tpu.memory_space<vmem>>, vector<16x16xf32>
    %c0_5 = arith.constant 0 : index
    %c0_6 = arith.constant 0 : index
    %3 = vector.load %arg3[%c0_5, %c0_6] : memref<32x96xf32, #tpu.memory_space<vmem>>, vector<32x96xf32>
    %c0_7 = arith.constant 0 : index
    %c0_8 = arith.constant 0 : index
    %4 = vector.load %arg4[%c0_7, %c0_8] : memref<32x32xf32, #tpu.memory_space<vmem>>, vector<32x32xf32>
    %c0_9 = arith.constant 0 : index
    %c0_10 = arith.constant 0 : index
    %5 = vector.load %arg5[%c0_9, %c0_10] : memref<1x32xf32, #tpu.memory_space<vmem>>, vector<1x32xf32>
    %cst = arith.constant dense<0.000000e+00> : vector<16x96xf32>
    %6 = tpu.matmul %0, %3, %cst {dimension_numbers = #tpu.dot_dimension_numbers<[1], [0], [0], [1], [0, 0, 1, 1], [], []>} : vector<16x32xf32>, vector<32x96xf32>, vector<16x96xf32> -> vector<16x96xf32>
    %7 = vector.extract_strided_slice %6 {offsets = [0, 0], sizes = [16, 32], strides = [1, 1]} : vector<16x96xf32> to vector<16x32xf32>
    %8 = vector.extract_strided_slice %6 {offsets = [0, 32], sizes = [16, 32], strides = [1, 1]} : vector<16x96xf32> to vector<16x32xf32>
    %9 = vector.extract_strided_slice %6 {offsets = [0, 64], sizes = [16, 32], strides = [1, 1]} : vector<16x96xf32> to vector<16x32xf32>
    %cst_11 = arith.constant dense<0.000000e+00> : vector<256x32xf32>
    %10 = tpu.matmul %1, %4, %cst_11 {dimension_numbers = #tpu.dot_dimension_numbers<[1], [0], [0], [1], [0, 0, 1, 1], [], []>} : vector<256x32xf32>, vector<32x32xf32>, vector<256x32xf32> -> vector<256x32xf32>
    %11 = vector.shape_cast %10 : vector<256x32xf32> to vector<16x16x32xf32>
    %12 = vector.shape_cast %8 : vector<16x32xf32> to vector<16x1x32xf32>
    %13 = vector.broadcast %12 : vector<16x1x32xf32> to vector<16x16x32xf32>
    %14 = arith.addf %11, %13 : vector<16x16x32xf32>
    %15 = vector.shape_cast %7 : vector<16x32xf32> to vector<1x16x32xf32>
    %16 = vector.broadcast %15 : vector<1x16x32xf32> to vector<16x16x32xf32>
    %17 = arith.addf %14, %16 : vector<16x16x32xf32>
    %cst_12 = arith.constant 0.000000e+00 : f32
    %18 = vector.broadcast %cst_12 : f32 to vector<16x16x32xf32>
    %19 = arith.cmpf ogt, %17, %18 : vector<16x16x32xf32>
    %cst_13 = arith.constant 0.00999999977 : f32
    %20 = vector.broadcast %cst_13 : f32 to vector<16x16x32xf32>
    %21 = arith.mulf %20, %17 : vector<16x16x32xf32>
    %22 = arith.select %19, %17, %21 : vector<16x16x32xi1>, vector<16x16x32xf32>
    %23 = vector.shape_cast %5 : vector<1x32xf32> to vector<1x1x32xf32>
    %24 = vector.broadcast %23 : vector<1x1x32xf32> to vector<16x16x32xf32>
    %25 = arith.mulf %22, %24 : vector<16x16x32xf32>
    %cst_14 = arith.constant dense<0.000000e+00> : vector<16x16xf32>
    %26 = vector.multi_reduction <add>, %25, %cst_14 [2] : vector<16x16x32xf32> to vector<16x16xf32>
    %cst_15 = arith.constant 0.000000e+00 : f32
    %27 = vector.broadcast %cst_15 : f32 to vector<16x16xf32>
    %28 = arith.cmpf ogt, %2, %27 : vector<16x16xf32>
    %cst_16 = arith.constant -1.000000e+30 : f32
    %29 = vector.broadcast %cst_16 : f32 to vector<16x16xf32>
    %30 = arith.select %28, %26, %29 : vector<16x16xi1>, vector<16x16xf32>
    %cst_17 = arith.constant dense<0xFF800000> : vector<16xf32>
    %31 = vector.multi_reduction <maximumf>, %30, %cst_17 [1] : vector<16x16xf32> to vector<16xf32>
    %32 = vector.shape_cast %31 : vector<16xf32> to vector<16x1xf32>
    %33 = vector.broadcast %32 : vector<16x1xf32> to vector<16x16xf32>
    %34 = arith.subf %30, %33 : vector<16x16xf32>
    %35 = math.exp %34 : vector<16x16xf32>
    %36 = arith.mulf %35, %2 : vector<16x16xf32>
    %cst_18 = arith.constant dense<0.000000e+00> : vector<16xf32>
    %37 = vector.multi_reduction <add>, %36, %cst_18 [1] : vector<16x16xf32> to vector<16xf32>
    %38 = vector.shape_cast %37 : vector<16xf32> to vector<16x1xf32>
    %cst_19 = arith.constant 9.99999968E-21 : f32
    %39 = vector.broadcast %cst_19 : f32 to vector<16x1xf32>
    %40 = arith.maximumf %38, %39 : vector<16x1xf32>
    %cst_20 = arith.constant dense<0.000000e+00> : vector<16x32xf32>
    %41 = tpu.matmul %36, %9, %cst_20 {dimension_numbers = #tpu.dot_dimension_numbers<[1], [0], [0], [1], [0, 0, 1, 1], [], []>} : vector<16x16xf32>, vector<16x32xf32>, vector<16x32xf32> -> vector<16x32xf32>
    %42 = vector.broadcast %40 : vector<16x1xf32> to vector<16x32xf32>
    %43 = arith.divf %41, %42 : vector<16x32xf32>
    %cst_21 = arith.constant 0.000000e+00 : f32
    %44 = vector.broadcast %cst_21 : f32 to vector<16x32xf32>
    %45 = arith.maximumf %43, %44 : vector<16x32xf32>
    %46 = arith.addf %45, %0 : vector<16x32xf32>
    %cst_22 = arith.constant 0.000000e+00 : f32
    %47 = vector.broadcast %cst_22 : f32 to vector<16x16x32xf32>
    %48 = arith.maximumf %22, %47 : vector<16x16x32xf32>
    %49 = vector.shape_cast %48 : vector<16x16x32xf32> to vector<256x32xf32>
    %50 = arith.addf %49, %1 : vector<256x32xf32>
    %c0_23 = arith.constant 0 : index
    %c0_24 = arith.constant 0 : index
    %51 = vector.load %arg6[%c0_23, %c0_24] : memref<32x96xf32, #tpu.memory_space<vmem>>, vector<32x96xf32>
    %c0_25 = arith.constant 0 : index
    %c0_26 = arith.constant 0 : index
    %52 = vector.load %arg7[%c0_25, %c0_26] : memref<32x32xf32, #tpu.memory_space<vmem>>, vector<32x32xf32>
    %c0_27 = arith.constant 0 : index
    %c0_28 = arith.constant 0 : index
    %53 = vector.load %arg8[%c0_27, %c0_28] : memref<1x32xf32, #tpu.memory_space<vmem>>, vector<1x32xf32>
    %cst_29 = arith.constant dense<0.000000e+00> : vector<16x96xf32>
    %54 = tpu.matmul %46, %51, %cst_29 {dimension_numbers = #tpu.dot_dimension_numbers<[1], [0], [0], [1], [0, 0, 1, 1], [], []>} : vector<16x32xf32>, vector<32x96xf32>, vector<16x96xf32> -> vector<16x96xf32>
    %55 = vector.extract_strided_slice %54 {offsets = [0, 0], sizes = [16, 32], strides = [1, 1]} : vector<16x96xf32> to vector<16x32xf32>
    %56 = vector.extract_strided_slice %54 {offsets = [0, 32], sizes = [16, 32], strides = [1, 1]} : vector<16x96xf32> to vector<16x32xf32>
    %57 = vector.extract_strided_slice %54 {offsets = [0, 64], sizes = [16, 32], strides = [1, 1]} : vector<16x96xf32> to vector<16x32xf32>
    %cst_30 = arith.constant dense<0.000000e+00> : vector<256x32xf32>
    %58 = tpu.matmul %50, %52, %cst_30 {dimension_numbers = #tpu.dot_dimension_numbers<[1], [0], [0], [1], [0, 0, 1, 1], [], []>} : vector<256x32xf32>, vector<32x32xf32>, vector<256x32xf32> -> vector<256x32xf32>
    %59 = vector.shape_cast %58 : vector<256x32xf32> to vector<16x16x32xf32>
    %60 = vector.shape_cast %56 : vector<16x32xf32> to vector<16x1x32xf32>
    %61 = vector.broadcast %60 : vector<16x1x32xf32> to vector<16x16x32xf32>
    %62 = arith.addf %59, %61 : vector<16x16x32xf32>
    %63 = vector.shape_cast %55 : vector<16x32xf32> to vector<1x16x32xf32>
    %64 = vector.broadcast %63 : vector<1x16x32xf32> to vector<16x16x32xf32>
    %65 = arith.addf %62, %64 : vector<16x16x32xf32>
    %cst_31 = arith.constant 0.000000e+00 : f32
    %66 = vector.broadcast %cst_31 : f32 to vector<16x16x32xf32>
    %67 = arith.cmpf ogt, %65, %66 : vector<16x16x32xf32>
    %cst_32 = arith.constant 0.00999999977 : f32
    %68 = vector.broadcast %cst_32 : f32 to vector<16x16x32xf32>
    %69 = arith.mulf %68, %65 : vector<16x16x32xf32>
    %70 = arith.select %67, %65, %69 : vector<16x16x32xi1>, vector<16x16x32xf32>
    %71 = vector.shape_cast %53 : vector<1x32xf32> to vector<1x1x32xf32>
    %72 = vector.broadcast %71 : vector<1x1x32xf32> to vector<16x16x32xf32>
    %73 = arith.mulf %70, %72 : vector<16x16x32xf32>
    %cst_33 = arith.constant dense<0.000000e+00> : vector<16x16xf32>
    %74 = vector.multi_reduction <add>, %73, %cst_33 [2] : vector<16x16x32xf32> to vector<16x16xf32>
    %cst_34 = arith.constant 0.000000e+00 : f32
    %75 = vector.broadcast %cst_34 : f32 to vector<16x16xf32>
    %76 = arith.cmpf ogt, %2, %75 : vector<16x16xf32>
    %cst_35 = arith.constant -1.000000e+30 : f32
    %77 = vector.broadcast %cst_35 : f32 to vector<16x16xf32>
    %78 = arith.select %76, %74, %77 : vector<16x16xi1>, vector<16x16xf32>
    %cst_36 = arith.constant dense<0xFF800000> : vector<16xf32>
    %79 = vector.multi_reduction <maximumf>, %78, %cst_36 [1] : vector<16x16xf32> to vector<16xf32>
    %80 = vector.shape_cast %79 : vector<16xf32> to vector<16x1xf32>
    %81 = vector.broadcast %80 : vector<16x1xf32> to vector<16x16xf32>
    %82 = arith.subf %78, %81 : vector<16x16xf32>
    %83 = math.exp %82 : vector<16x16xf32>
    %84 = arith.mulf %83, %2 : vector<16x16xf32>
    %cst_37 = arith.constant dense<0.000000e+00> : vector<16xf32>
    %85 = vector.multi_reduction <add>, %84, %cst_37 [1] : vector<16x16xf32> to vector<16xf32>
    %86 = vector.shape_cast %85 : vector<16xf32> to vector<16x1xf32>
    %cst_38 = arith.constant 9.99999968E-21 : f32
    %87 = vector.broadcast %cst_38 : f32 to vector<16x1xf32>
    %88 = arith.maximumf %86, %87 : vector<16x1xf32>
    %cst_39 = arith.constant dense<0.000000e+00> : vector<16x32xf32>
    %89 = tpu.matmul %84, %57, %cst_39 {dimension_numbers = #tpu.dot_dimension_numbers<[1], [0], [0], [1], [0, 0, 1, 1], [], []>} : vector<16x16xf32>, vector<16x32xf32>, vector<16x32xf32> -> vector<16x32xf32>
    %90 = vector.broadcast %88 : vector<16x1xf32> to vector<16x32xf32>
    %91 = arith.divf %89, %90 : vector<16x32xf32>
    %92 = arith.addf %91, %0 : vector<16x32xf32>
    %c0_40 = arith.constant 0 : index
    %c0_41 = arith.constant 0 : index
    %93 = vector.load %arg9[%c0_40, %c0_41] : memref<16x32xf32, #tpu.memory_space<vmem>>, vector<16x32xf32>
    tpu.vector_store %arg9[%c0_40, %c0_41], %92 {strides = array<i32>} : memref<16x32xf32, #tpu.memory_space<vmem>>, vector<16x32xf32>,
    return
  }
}

</mosaic_0001>

<bundles_post_ra>
// kernel: tpu_custom_call.1
= control target key start
LH: loop header
LB: loop body
LE: loop exit
PB: predicated region body
PF: predicated region fallthrough
CT: control target
= control target key end

     0   :  { %vm78_vm0 = vcmask 261120   ;;  %s3075_s0 = inlined_call_operand.vmem [shape: f32[16,32], index: 0, kind: input, shape index: {}]   ;;  %s3076_s1 = inlined_call_operand.vmem [shape: f32[256,32], index: 1, kind: input, shape index: {}]   ;;  %s3077_s2 = inlined_call_operand.vmem [shape: f32[16,16], index: 2, kind: input, shape index: {}]   ;;  %s3078_s3 = inlined_call_operand.vmem [shape: f32[32,96], index: 3, kind: input, shape index: {}]   ;;  %s3079_s4 = inlined_call_operand.vmem [shape: f32[32,32], index: 4, kind: input, shape index: {}]   ;;  %s3080_s5 = inlined_call_operand.vmem [shape: f32[1,32], index: 5, kind: input, shape index: {}]   ;;  %s3081_s6 = inlined_call_operand.vmem [shape: f32[32,96], index: 6, kind: input, shape index: {}]   ;;  %s3082_s7 = inlined_call_operand.vmem [shape: f32[32,32], index: 7, kind: input, shape index: {}]   ;;  %s3083_s8 = inlined_call_operand.vmem [shape: f32[1,32], index: 8, kind: input, shape index: {}]   ;;  %s3084_s9 = inlined_call_operand.hbm [shape: f32[16,32], index: 9, kind: output, shape index: {}]  }
   0x1   :  { %v72_v0 = vld [vmem:[%s3078_s3 + $0x18] sm:$0xff]  ;;  %v71_v1 = vld [vmem:[%s3078_s3 + $0x10] sm:$0xff]  ;;  %v70_v3 = vld [vmem:[%s3078_s3 + $0x8] sm:$0xff] }
   0x2   :  { %97 = vmatpush.msra.mxu0 %v72_v0  ;;  %v76_v2 = vld [vmem:[%s3079_s4 + $0x18] sm:$0xff]  ;;  %v75_v4 = vld [vmem:[%s3079_s4 + $0x10] sm:$0xff]  ;;  %v74_v5 = vld [vmem:[%s3079_s4 + $0x8] sm:$0xff] }
   0x3   :  { %1852 = vmatpush.msra.mxu1 %v76_v2  ;;  %v69_v6 = vld [vmem:[%s3078_s3] sm:$0xff]  ;;  %v49_v9 = vld [vmem:[%s3076_s1 + $0x70] sm:$0xff] }
   0x4   :  { %98 = vmatpush.msra.mxu0 %v71_v1  ;;  %v33_v7 = vld [vmem:[%s3075_s0] sm:$0xff] }
   0x5   :  { %1853 = vmatpush.msra.mxu1 %v75_v4  ;;  %v73_v8 = vld [vmem:[%s3079_s4] sm:$0xff] }
   0x6   :  { %99 = vmatpush.msra.mxu0 %v70_v3 }
   0x7   :  { %1854 = vmatpush.msra.mxu1 %v74_v5 }
   0x8   :  { %14 = vsyncpa [#allocation3], 0  ;;  %100 = vmatpush.msra.mxu0 %v69_v6  ;;  %v34_v10 = vld [vmem:[%s3075_s0 + $0x8] sm:$0xff]  ;;  %v50_v11 = vld [vmem:[%s3076_s1 + $0x78] sm:$0xff]  ;;  %s1959_s22 = smov 96   ;;  %s1961_s24 = smov [#allocation2]  }
   0x9   :  { %1780 = vmatmul.msk.f32.vlgmr.msra.gmra.mxu0 %vm78_vm0, %v33_v7  ;;  %1855 = vmatpush.msra.mxu1 %v73_v8  ;;  %v35_v12 = vld [vmem:[%s3076_s1] sm:$0xff]  ;;  %v36_v14 = vld [vmem:[%s3076_s1 + $0x8] sm:$0xff]  ;;  %v37_v16 = vld [vmem:[%s3076_s1 + $0x10] sm:$0xff]  ;;  %s1766_s25 = sshll.u32 %s1961_s24, 4  ;;  %s1768_s28 = sshll.u32 %s3084_s9, 4  ;;  %s1767_s25 = int_to_ptr.vmem [resolvable:$true] %s1766_s25  ;;  %s1769_s28 = int_to_ptr.hbm [resolvable:$true] %s1768_s28 }
   0xa   :  { %1796 = vmatmul.msk.f32.vlgmr.msra.gmra.mxu1 %vm78_vm0, %v49_v9  ;;  %216 = vmatpush.msrb.mxu0 %v76_v2  ;;  %v51_v13 = vld [vmem:[%s3076_s1 + $0x80] sm:$0xff]  ;;  %v52_v15 = vld [vmem:[%s3076_s1 + $0x88] sm:$0xff]  ;;  %v53_v17 = vld [vmem:[%s3076_s1 + $0x90] sm:$0xff]  ;;  %s1963_s4 = smov 8  }
   0xb   :  { %v38_v18 = vld [vmem:[%s3076_s1 + $0x18] sm:$0xff]  ;;  %v39_v20 = vld [vmem:[%s3076_s1 + $0x20] sm:$0xff]  ;;  %v40_v22 = vld [vmem:[%s3076_s1 + $0x28] sm:$0xff] }
   0xc   :  { %217 = vmatpush.msrb.mxu0 %v75_v4  ;;  %v54_v19 = vld [vmem:[%s3076_s1 + $0x98] sm:$0xff]  ;;  %v55_v21 = vld [vmem:[%s3076_s1 + $0xa0] sm:$0xff]  ;;  %v56_v23 = vld [vmem:[%s3076_s1 + $0xa8] sm:$0xff] }
   0xd   :  { %v41_v24 = vld [vmem:[%s3076_s1 + $0x30] sm:$0xff]  ;;  %v42_v26 = vld [vmem:[%s3076_s1 + $0x38] sm:$0xff]  ;;  %v43_v28 = vld [vmem:[%s3076_s1 + $0x40] sm:$0xff] }
   0xe   :  { %218 = vmatpush.msrb.mxu0 %v74_v5  ;;  %v57_v25 = vld [vmem:[%s3076_s1 + $0xb0] sm:$0xff]  ;;  %v58_v27 = vld [vmem:[%s3076_s1 + $0xb8] sm:$0xff]  ;;  %v59_v29 = vld [vmem:[%s3076_s1 + $0xc0] sm:$0xff] }
   0xf   :  { %v44_v30 = vld [vmem:[%s3076_s1 + $0x48] sm:$0xff]  ;;  %v45_v32 = vld [vmem:[%s3076_s1 + $0x50] sm:$0xff]  ;;  %v46_v34 = vld [vmem:[%s3076_s1 + $0x58] sm:$0xff] }
  0x10   :  { %219 = vmatpush.msrb.mxu0 %v73_v8  ;;  %v60_v31 = vld [vmem:[%s3076_s1 + $0xc8] sm:$0xff]  ;;  %v61_v33 = vld [vmem:[%s3076_s1 + $0xd0] sm:$0xff]  ;;  %v62_v35 = vld [vmem:[%s3076_s1 + $0xd8] sm:$0xff] }
  0x11   :  { %1781 = vmatmul.msk.f32.gmra.mxu0 %vm78_vm0, %v34_v10  ;;  %v47_v36 = vld [vmem:[%s3076_s1 + $0x60] sm:$0xff]  ;;  %v48_v38 = vld [vmem:[%s3076_s1 + $0x68] sm:$0xff]  ;;  %v65_v44 = vld [vmem:[%s3076_s1 + $0xf0] sm:$0xff] }
  0x12   :  { %1797 = vmatmul.msk.f32.gmra.mxu1 %vm78_vm0, %v50_v11  ;;  %v63_v37 = vld [vmem:[%s3076_s1 + $0xe0] sm:$0xff]  ;;  %v64_v39 = vld [vmem:[%s3076_s1 + $0xe8] sm:$0xff]  ;;  %v66_v52 = vld [vmem:[%s3076_s1 + $0xf8] sm:$0xff] }
  0x19   :  { %1782 = vmatmul.msk.f32.vlgmr.msrb.gmra.mxu0 %vm78_vm0, %v35_v12 }
  0x1a   :  { %1798 = vmatmul.msk.f32.gmra.mxu1 %vm78_vm0, %v51_v13 }
  0x21   :  { %1783 = vmatmul.msk.f32.gmra.mxu0 %vm78_vm0, %v36_v14 }
  0x22   :  { %1799 = vmatmul.msk.f32.gmra.mxu1 %vm78_vm0, %v52_v15 }
  0x29   :  { %1784 = vmatmul.msk.f32.gmra.mxu0 %vm78_vm0, %v37_v16 }
  0x2a   :  { %1800 = vmatmul.msk.f32.gmra.mxu1 %vm78_vm0, %v53_v17 }
  0x31   :  { %1785 = vmatmul.msk.f32.gmra.mxu0 %vm78_vm0, %v38_v18 }
  0x32   :  { %1801 = vmatmul.msk.f32.gmra.mxu1 %vm78_vm0, %v54_v19 }
  0x39   :  { %1786 = vmatmul.msk.f32.gmra.mxu0 %vm78_vm0, %v39_v20 }
  0x3a   :  { %1802 = vmatmul.msk.f32.gmra.mxu1 %vm78_vm0, %v55_v21 }
  0x41   :  { %1787 = vmatmul.msk.f32.gmra.mxu0 %vm78_vm0, %v40_v22 }
  0x42   :  { %1803 = vmatmul.msk.f32.gmra.mxu1 %vm78_vm0, %v56_v23 }
  0x49   :  { %1788 = vmatmul.msk.f32.gmra.mxu0 %vm78_vm0, %v41_v24 }
  0x4a   :  { %1804 = vmatmul.msk.f32.gmra.mxu1 %vm78_vm0, %v57_v25 }
  0x51   :  { %1789 = vmatmul.msk.f32.gmra.mxu0 %vm78_vm0, %v42_v26 }
  0x52   :  { %1805 = vmatmul.msk.f32.gmra.mxu1 %vm78_vm0, %v58_v27 }
  0x59   :  { %1790 = vmatmul.msk.f32.gmra.mxu0 %vm78_vm0, %v43_v28 }
  0x5a   :  { %1806 = vmatmul.msk.f32.gmra.mxu1 %vm78_vm0, %v59_v29 }
  0x61   :  { %1791 = vmatmul.msk.f32.gmra.mxu0 %vm78_vm0, %v44_v30 }
  0x62   :  { %1807 = vmatmul.msk.f32.gmra.mxu1 %vm78_vm0, %v60_v31 }
  0x69   :  { %1792 = vmatmul.msk.f32.gmra.mxu0 %vm78_vm0, %v45_v32 }
  0x6a   :  { %1808 = vmatmul.msk.f32.gmra.mxu1 %vm78_vm0, %v61_v33 }
  0x71   :  { %1793 = vmatmul.msk.f32.gmra.mxu0 %vm78_vm0, %v46_v34 }
  0x72   :  { %1809 = vmatmul.msk.f32.gmra.mxu1 %vm78_vm0, %v62_v35 }
  0x79   :  { %1794 = vmatmul.msk.f32.gmra.mxu0 %vm78_vm0, %v47_v36 }
  0x7a   :  { %1810 = vmatmul.msk.f32.gmra.mxu1 %vm78_vm0, %v63_v37 }
  0x81   :  { %1795 = vmatmul.msk.f32.gmra.mxu0 %vm78_vm0, %v48_v38 }
  0x82   :  { %1811 = vmatmul.msk.f32.gmra.mxu1 %vm78_vm0, %v64_v39 }
  0x86   :  { %v2166_v40 = vpop.f32.mrf.mxu0 }
  0x87   :  { %v333_v41 = vperm.slane %v2166_v40, 0  ;;  %v322_v42 = vrot.slane %v2166_v40, 4  ;;  %v320_v43 = vrot.slane %v2166_v40, 2  ;;  %v319_v47 = vrot.slane %v2166_v40, 1  ;;  %v2193_v60 = vpop.f32.mrf.mxu1 }
  0x88   :  { %v323_v48 = vrot.slane %v2166_v40, 5  ;;  %v321_v49 = vrot.slane %v2166_v40, 3  ;;  %v324_v55 = vrot.slane %v2166_v40, 6  ;;  %v325_v56 = vrot.slane %v2166_v40, 7 }
  0x89   :  { %349 = vrot.lane.b32.xlu0 %v333_v41, %s1959_s22  ;;  %v337_v45 = vperm.slane %v322_v42, 0  ;;  %v335_v46 = vperm.slane %v320_v43, 0  ;;  %v334_v51 = vperm.slane %v319_v47, 0 }
  0x8a   :  { %1812 = vmatmul.msk.f32.gmra.mxu1 %vm78_vm0, %v65_v44  ;;  %v338_v53 = vperm.slane %v323_v48, 0  ;;  %v336_v54 = vperm.slane %v321_v49, 0  ;;  %v339_v58 = vperm.slane %v324_v55, 0  ;;  %v340_v61 = vperm.slane %v325_v56, 0  ;;  %v2240_v44 = vld [vmem:[%s3080_s5] ss:$0 sm:$0xff] }
  0x8b   :  { %357 = vrot.lane.b32.xlu2 %v337_v45, %s1959_s22  ;;  %353 = vrot.lane.b32.xlu1 %v335_v46, %s1959_s22  ;;  %s1960_s5 = smov 64  }
  0x8e   :  { %v2181_v50 = vpop.f32.mrf.mxu0 }
  0x8f   :  { %v341_v59 = vperm.slane %v2181_v50, 0  ;;  %v326_v62 = vrot.slane %v2181_v50, 1  ;;  %v328_v63 = vrot.slane %v2181_v50, 3  ;;  %v327_v0 = vrot.slane %v2181_v50, 2  ;;  %v2203_v6 = vpop.f32.mrf.mxu1 }
  0x90   :  { %v329_v5 = vrot.slane %v2181_v50, 4  ;;  %v331_v7 = vrot.slane %v2181_v50, 6  ;;  %v330_v8 = vrot.slane %v2181_v50, 5  ;;  %v332_v13 = vrot.slane %v2181_v50, 7 }
  0x91   :  { %351 = vrot.lane.b32.xlu0 %v334_v51, %s1959_s22  ;;  %v342_v1 = vperm.slane %v326_v62, 0  ;;  %v344_v3 = vperm.slane %v328_v63, 0  ;;  %v343_v4 = vperm.slane %v327_v0, 0 }
  0x92   :  { %1813 = vmatmul.msk.f32.gmra.mxu1 %vm78_vm0, %v66_v52  ;;  %v345_v9 = vperm.slane %v329_v5, 0  ;;  %v347_v11 = vperm.slane %v331_v7, 0  ;;  %v346_v12 = vperm.slane %v330_v8, 0  ;;  %v348_v15 = vperm.slane %v332_v13, 0 }
  0x93   :  { %359 = vrot.lane.b32.xlu2 %v338_v53, %s1959_s22  ;;  %355 = vrot.lane.b32.xlu1 %v336_v54, %s1959_s22 }
  0x96   :  { %v221_v57 = vpop.f32.mrf.mxu0 }
  0x97   :  { %v2213_v14 = vpop.f32.mrf.mxu1 }
  0x99   :  { %361 = vrot.lane.b32.xlu0 %v339_v58, %s1959_s22 }
  0x9b   :  { %363 = vrot.lane.b32.xlu1 %v340_v61, %s1959_s22  ;;  %365 = vrot.lane.b32.xlu2 %v341_v59, %s1959_s22 }
  0x9e   :  { %v224_v2 = vpop.f32.mrf.mxu0 }
  0x9f   :  { %v2216_v17 = vpop.f32.mrf.mxu1 }
  0xa1   :  { %367 = vrot.lane.b32.xlu0 %v342_v1, %s1959_s22 }
  0xa3   :  { %371 = vrot.lane.b32.xlu2 %v344_v3, %s1959_s22  ;;  %369 = vrot.lane.b32.xlu1 %v343_v4, %s1959_s22 }
  0xa6   :  { %v227_v10 = vpop.f32.mrf.mxu0 }
  0xa7   :  { %v2218_v19 = vpop.f32.mrf.mxu1 }
  0xa9   :  { %373 = vrot.lane.b32.xlu0 %v345_v9, %s1959_s22 }
  0xab   :  { %377 = vrot.lane.b32.xlu2 %v347_v11, %s1959_s22  ;;  %375 = vrot.lane.b32.xlu1 %v346_v12, %s1959_s22 }
  0xae   :  { %v230_v16 = vpop.f32.mrf.mxu0 }
  0xaf   :  { %v2220_v21 = vpop.f32.mrf.mxu1 }
  0xb1   :  { %379 = vrot.lane.b32.xlu0 %v348_v15, %s1959_s22 }
  0xb6   :  { %v233_v18 = vpop.f32.mrf.mxu0 }
  0xb7   :  { %v2222_v23 = vpop.f32.mrf.mxu1 }
  0xbe   :  { %v236_v20 = vpop.f32.mrf.mxu0 }
  0xbf   :  { %v2224_v25 = vpop.f32.mrf.mxu1 }
  0xc6   :  { %v239_v22 = vpop.f32.mrf.mxu0 }
  0xc7   :  { %v2226_v27 = vpop.f32.mrf.mxu1 }
  0xce   :  { %v242_v24 = vpop.f32.mrf.mxu0 }
  0xcf   :  { %v2228_v29 = vpop.f32.mrf.mxu1 }
  0xd6   :  { %v245_v26 = vpop.f32.mrf.mxu0 }
  0xd7   :  { %v2230_v32 = vpop.f32.mrf.mxu1 }
  0xde   :  { %v248_v28 = vpop.f32.mrf.mxu0 }
  0xdf   :  { %v2251_v58 = vpop.f32.mrf.mxu1 }
  0xe5   :  { %v358_v35 = vpop.permute.xlu2 %357 }
  0xe6   :  { %v251_v30 = vpop.f32.mrf.mxu0  ;;  %v406_v9 = vadd.f32 %v358_v35, %v248_v28 }
  0xed   :  { %v360_v0 = vpop.permute.xlu2 %359 }
  0xee   :  { %v2232_v37 = vpop.f32.mrf.mxu0 }
  0xf6   :  { %v257_v62 = vpop.f32.mrf.mxu0 }
  0xfb   :  { %v350_v31 = vpop.permute.xlu0 %349 }
  0xfc   :  { %v397_v33 = vadd.f32 %v350_v31, %v221_v57  ;;  %v398_v34 = vadd.f32 %v350_v31, %v224_v2 }
  0xfd   :  { %v354_v36 = vpop.permute.xlu1 %353 }
  0xfe   :  { %v429_v38 = vadd.f32 %v397_v33, %v2166_v40  ;;  %v430_v39 = vadd.f32 %v398_v34, %v2181_v50  ;;  %v401_v41 = vadd.f32 %v354_v36, %v233_v18  ;;  %v402_v47 = vadd.f32 %v354_v36, %v236_v20 }
  0xff   :  { %v405_v18 = vadd.f32 %v358_v35, %v245_v26 }
 0x100   :  { %v433_v42 = vadd.f32 %v401_v41, %v2166_v40  ;;  %vm461_vm1 = vcmp.gt.f32.partialorder %v429_v38, 0.0  ;;  %v493_v43 = vmul.f32 0.01, %v429_v38  ;;  %vm462_vm2 = vcmp.gt.f32.partialorder %v430_v39, 0.0  ;;  %v260_v41 = vpop.f32.mrf.mxu0 }
 0x101   :  { %v494_v45 = vmul.f32 0.01, %v430_v39  ;;  %v434_v4 = vadd.f32 %v402_v47, %v2181_v50 }
 0x102   :  { %v2242_v46 = vsel %vm461_vm1, %v429_v38, %v493_v43  ;;  %v497_v52 = vmul.f32 0.01, %v433_v42  ;;  %vm465_vm3 = vcmp.gt.f32.partialorder %v433_v42, 0.0  ;;  %v437_v38 = vadd.f32 %v405_v18, %v2166_v40 }
 0x103   :  { %v352_v48 = vpop.permute.xlu0 %351  ;;  %v560_v49 = vmul.f32 %v2240_v44, %v2242_v46  ;;  %v2246_v51 = vsel %vm462_vm2, %v430_v39, %v494_v45  ;;  %vm466_vm6 = vcmp.gt.f32.partialorder %v434_v4, 0.0  ;;  %v2279_v39 = vpop.f32.mrf.mxu1 }
 0x104   :  { %v399_v53 = vadd.f32 %v352_v48, %v227_v10  ;;  %v400_v54 = vadd.f32 %v352_v48, %v230_v16  ;;  %v561_v55 = vmul.f32 %v2240_v44, %v2246_v51  ;;  %v2256_v3 = vsel %vm465_vm3, %v433_v42, %v497_v52 }
 0x105   :  { %v356_v56 = vpop.permute.xlu1 %355  ;;  %v592_v57 = vsel %vm78_vm0, %v560_v49, 0.0  ;;  %v407_v10 = vadd.f32 %v360_v0, %v251_v30  ;;  %v564_v12 = vmul.f32 %v2240_v44, %v2256_v3  ;;  %v438_v30 = vadd.f32 %v406_v9, %v2181_v50 }
 0x106   :  { %v431_v59 = vadd.f32 %v399_v53, %v2166_v40  ;;  %v432_v61 = vadd.f32 %v400_v54, %v2181_v50  ;;  %v403_v63 = vadd.f32 %v356_v56, %v239_v22  ;;  %593 = vadd.xlane.f32.xlu1 %v592_v57  ;;  %v404_v1 = vadd.f32 %v356_v56, %v242_v24 }
 0x107   :  { %v595_v2 = vsel %vm78_vm0, %v561_v55, 0.0  ;;  %v498_v22 = vmul.f32 0.01, %v434_v4  ;;  %v439_v31 = vadd.f32 %v407_v10, %v2166_v40  ;;  %v604_v33 = vsel %vm78_vm0, %v564_v12, 0.0 }
 0x108   :  { %596 = vadd.xlane.f32.xlu2 %v595_v2  ;;  %vm463_vm4 = vcmp.gt.f32.partialorder %v431_v59, 0.0  ;;  %v495_v5 = vmul.f32 0.01, %v431_v59  ;;  %v435_v7 = vadd.f32 %v403_v63, %v2166_v40  ;;  %vm464_vm5 = vcmp.gt.f32.partialorder %v432_v61, 0.0 }
 0x109   :  { %v496_v8 = vmul.f32 0.01, %v432_v61  ;;  %v436_v13 = vadd.f32 %v404_v1, %v2181_v50  ;;  %v2282_v42 = vsel %vm466_vm6, %v434_v4, %v498_v22  ;;  %v502_v49 = vmul.f32 0.01, %v438_v30 }
 0x10a   :  { %v2260_v11 = vsel %vm463_vm4, %v431_v59, %v495_v5  ;;  %vm467_vm7 = vcmp.gt.f32.partialorder %v435_v7, 0.0  ;;  %v499_v28 = vmul.f32 0.01, %v435_v7  ;;  %v565_v53 = vmul.f32 %v2240_v44, %v2282_v42 }
 0x10b   :  { %v562_v15 = vmul.f32 %v2240_v44, %v2260_v11  ;;  %v2267_v16 = vsel %vm464_vm5, %v432_v61, %v496_v8  ;;  %v362_v34 = vpop.permute.xlu0 %361  ;;  %vm468_vm8 = vcmp.gt.f32.partialorder %v436_v13, 0.0  ;;  %v500_v35 = vmul.f32 0.01, %v436_v13  ;;  %v2307_v8 = vpop.f32.mrf.mxu1 }
 0x10c   :  { %v563_v20 = vmul.f32 %v2240_v44, %v2267_v16  ;;  %v2276_v26 = vsel %vm467_vm7, %v435_v7, %v499_v28  ;;  %v409_v47 = vadd.f32 %v362_v34, %v257_v62  ;;  %v410_v52 = vadd.f32 %v362_v34, %v260_v41 }
 0x10d   :  { %v598_v24 = vsel %vm78_vm0, %v562_v15, 0.0  ;;  %v566_v43 = vmul.f32 %v2240_v44, %v2276_v26  ;;  %v2286_v45 = vsel %vm468_vm8, %v436_v13, %v500_v35  ;;  %vm470_vm9 = vcmp.gt.f32.partialorder %v438_v30, 0.0  ;;  %v364_v1 = vpop.permute.xlu1 %363 }
 0x10e   :  { %599 = vadd.xlane.f32.xlu0 %v598_v24  ;;  %v601_v36 = vsel %vm78_vm0, %v563_v20, 0.0  ;;  %605 = vadd.xlane.f32.xlu1 %v604_v33  ;;  %v567_v48 = vmul.f32 %v2240_v44, %v2286_v45  ;;  %v503_v54 = vmul.f32 0.01, %v439_v31  ;;  %v408_v55 = vadd.f32 %v360_v0, %v2232_v37  ;;  %v366_v0 = vpop.permute.xlu2 %365 }
 0x10f   :  { %v501_v56 = vmul.f32 0.01, %v437_v38  ;;  %vm471_vm10 = vcmp.gt.f32.partialorder %v439_v31, 0.0  ;;  %v610_v57 = vsel %vm78_vm0, %v566_v43, 0.0  ;;  %vm469_vm11 = vcmp.gt.f32.partialorder %v437_v38, 0.0 }
 0x110   :  { %602 = vadd.xlane.f32.xlu2 %v601_v36  ;;  %v441_v59 = vadd.f32 %v409_v47, %v2166_v40  ;;  %v613_v61 = vsel %vm78_vm0, %v567_v48, 0.0  ;;  %v2296_v62 = vsel %vm470_vm9, %v438_v30, %v502_v49  ;;  %v442_v63 = vadd.f32 %v410_v52, %v2181_v50 }
 0x111   :  { %v607_v2 = vsel %vm78_vm0, %v565_v53, 0.0  ;;  %v2300_v4 = vsel %vm471_vm10, %v439_v31, %v503_v54  ;;  %v440_v37 = vadd.f32 %v408_v55, %v2181_v50  ;;  %v2303_v5 = vsel %vm469_vm11, %v437_v38, %v501_v56 }
 0x112   :  { %v569_v7 = vmul.f32 %v2240_v44, %v2296_v62  ;;  %v412_v9 = vadd.f32 %v364_v1, %v2203_v6  ;;  %v570_v10 = vmul.f32 %v2240_v44, %v2300_v4  ;;  %v505_v12 = vmul.f32 0.01, %v441_v59 }
 0x113   :  { %v413_v13 = vadd.f32 %v366_v0, %v2213_v14  ;;  %v506_v15 = vmul.f32 0.01, %v442_v63  ;;  %v568_v18 = vmul.f32 %v2240_v44, %v2303_v5  ;;  %vm473_vm12 = vcmp.gt.f32.partialorder %v441_v59, 0.0  ;;  %v368_v31 = vpop.permute.xlu0 %367  ;;  %v2337_v53 = vpop.f32.mrf.mxu1 }
 0x114   :  { %v504_v20 = vmul.f32 0.01, %v440_v37  ;;  %v411_v22 = vadd.f32 %v364_v1, %v2193_v60  ;;  %vm474_vm13 = vcmp.gt.f32.partialorder %v442_v63, 0.0  ;;  %v619_v24 = vsel %vm78_vm0, %v569_v7, 0.0 }
 0x115   :  { %vm472_vm14 = vcmp.gt.f32.partialorder %v440_v37, 0.0  ;;  %v444_v6 = vadd.f32 %v412_v9, %v2181_v50  ;;  %v622_v28 = vsel %vm78_vm0, %v570_v10, 0.0  ;;  %v2319_v30 = vsel %vm473_vm12, %v441_v59, %v505_v12  ;;  %v370_v59 = vpop.permute.xlu1 %369 }
 0x116   :  { %611 = vadd.xlane.f32.xlu0 %v610_v57  ;;  %614 = vadd.xlane.f32.xlu1 %v613_v61  ;;  %v445_v14 = vadd.f32 %v413_v13, %v2166_v40  ;;  %v616_v33 = vsel %vm78_vm0, %v568_v18, 0.0  ;;  %v2323_v34 = vsel %vm474_vm13, %v442_v63, %v506_v15  ;;  %v443_v60 = vadd.f32 %v411_v22, %v2166_v40  ;;  %v372_v1 = vpop.permute.xlu2 %371 }
 0x117   :  { %v2326_v36 = vsel %vm472_vm14, %v440_v37, %v504_v20  ;;  %v572_v35 = vmul.f32 %v2240_v44, %v2319_v30  ;;  %v415_v38 = vadd.f32 %v368_v31, %v2218_v19  ;;  %v573_v41 = vmul.f32 %v2240_v44, %v2323_v34 }
 0x118   :  { %608 = vadd.xlane.f32.xlu2 %v607_v2  ;;  %v508_v43 = vmul.f32 0.01, %v444_v6  ;;  %v416_v47 = vadd.f32 %v368_v31, %v2220_v21  ;;  %v571_v48 = vmul.f32 %v2240_v44, %v2326_v36  ;;  %vm476_vm15 = vcmp.gt.f32.partialorder %v444_v6, 0.0 }
 0x119   :  { %v509_v49 = vmul.f32 0.01, %v445_v14  ;;  %v414_v52 = vadd.f32 %v366_v0, %v2216_v17  ;;  %v507_v54 = vmul.f32 0.01, %v443_v60  ;;  %vm477_vm1 = vcmp.gt.f32.partialorder %v445_v14, 0.0 }
 0x11a   :  { %v628_v55 = vsel %vm78_vm0, %v572_v35, 0.0  ;;  %vm475_vm2 = vcmp.gt.f32.partialorder %v443_v60, 0.0  ;;  %v447_v19 = vadd.f32 %v415_v38, %v2166_v40  ;;  %v631_v56 = vsel %vm78_vm0, %v573_v41, 0.0 }
 0x11b   :  { %v2342_v21 = vsel %vm476_vm15, %v444_v6, %v508_v43  ;;  %v448_v57 = vadd.f32 %v416_v47, %v2181_v50  ;;  %v625_v61 = vsel %vm78_vm0, %v571_v48, 0.0  ;;  %v2346_v17 = vsel %vm477_vm1, %v445_v14, %v509_v49  ;;  %v2361_v22 = vpop.f32.mrf.mxu1 }
 0x11c   :  { %v446_v63 = vadd.f32 %v414_v52, %v2181_v50  ;;  %v2349_v2 = vsel %vm475_vm2, %v443_v60, %v507_v54  ;;  %v575_v37 = vmul.f32 %v2240_v44, %v2342_v21  ;;  %v418_v0 = vadd.f32 %v370_v59, %v2224_v25 }
 0x11d   :  { %v576_v7 = vmul.f32 %v2240_v44, %v2346_v17  ;;  %v511_v9 = vmul.f32 0.01, %v447_v19  ;;  %v419_v10 = vadd.f32 %v372_v1, %v2226_v27  ;;  %v574_v12 = vmul.f32 %v2240_v44, %v2349_v2 }
 0x11e   :  { %620 = vadd.xlane.f32.xlu0 %v619_v24  ;;  %623 = vadd.xlane.f32.xlu1 %v622_v28  ;;  %vm479_vm3 = vcmp.gt.f32.partialorder %v447_v19, 0.0  ;;  %v512_v13 = vmul.f32 0.01, %v448_v57  ;;  %v417_v15 = vadd.f32 %v370_v59, %v2222_v23  ;;  %v510_v18 = vmul.f32 0.01, %v446_v63  ;;  %v374_v28 = vpop.permute.xlu0 %373 }
 0x11f   :  { %vm480_vm4 = vcmp.gt.f32.partialorder %v448_v57, 0.0  ;;  %v637_v20 = vsel %vm78_vm0, %v575_v37, 0.0  ;;  %vm478_vm5 = vcmp.gt.f32.partialorder %v446_v63, 0.0  ;;  %v450_v25 = vadd.f32 %v418_v0, %v2181_v50 }
 0x120   :  { %617 = vadd.xlane.f32.xlu2 %v616_v33  ;;  %v640_v24 = vsel %vm78_vm0, %v576_v7, 0.0  ;;  %v2365_v27 = vsel %vm479_vm3, %v447_v19, %v511_v9  ;;  %v451_v6 = vadd.f32 %v419_v10, %v2166_v40  ;;  %v634_v14 = vsel %vm78_vm0, %v574_v12, 0.0 }
 0x121   :  { %v2369_v23 = vsel %vm480_vm4, %v448_v57, %v512_v13  ;;  %v449_v31 = vadd.f32 %v417_v15, %v2166_v40  ;;  %v2372_v33 = vsel %vm478_vm5, %v446_v63, %v510_v18  ;;  %v578_v60 = vmul.f32 %v2240_v44, %v2365_v27  ;;  %v376_v57 = vpop.permute.xlu1 %375  ;;  %v378_v63 = vpop.permute.xlu2 %377 }
 0x122   :  { %v421_v35 = vadd.f32 %v374_v28, %v2230_v32  ;;  %v579_v38 = vmul.f32 %v2240_v44, %v2369_v23  ;;  %v514_v41 = vmul.f32 0.01, %v450_v25  ;;  %v422_v43 = vadd.f32 %v374_v28, %v2251_v58 }
 0x123   :  { %v577_v47 = vmul.f32 %v2240_v44, %v2372_v33  ;;  %vm482_vm6 = vcmp.gt.f32.partialorder %v450_v25, 0.0  ;;  %v515_v48 = vmul.f32 0.01, %v451_v6  ;;  %v420_v49 = vadd.f32 %v372_v1, %v2228_v29 }
 0x124   :  { %v513_v52 = vmul.f32 0.01, %v449_v31  ;;  %vm483_vm7 = vcmp.gt.f32.partialorder %v451_v6, 0.0  ;;  %v646_v54 = vsel %vm78_vm0, %v578_v60, 0.0  ;;  %vm481_vm8 = vcmp.gt.f32.partialorder %v449_v31, 0.0 }
 0x125   :  { %v453_v32 = vadd.f32 %v421_v35, %v2166_v40  ;;  %v649_v19 = vsel %vm78_vm0, %v579_v38, 0.0  ;;  %v454_v58 = vadd.f32 %v422_v43, %v2181_v50  ;;  %v643_v59 = vsel %vm78_vm0, %v577_v47, 0.0 }
 0x126   :  { %629 = vadd.xlane.f32.xlu0 %v628_v55  ;;  %632 = vadd.xlane.f32.xlu1 %v631_v56  ;;  %v311_v55 = vpop.f32.mrf.mxu1  ;;  %v2386_v56 = vsel %vm482_vm6, %v450_v25, %v514_v41  ;;  %v2390_v29 = vsel %vm483_vm7, %v451_v6, %v515_v48  ;;  %v2393_v1 = vsel %vm481_vm8, %v449_v31, %v513_v52  ;;  %v380_v6 = vpop.permute.xlu0 %379  ;;  %vm727_vm3 = vcmask 130112  }
 0x127   :  { %v581_v37 = vmul.f32 %v2240_v44, %v2386_v56  ;;  %v424_v0 = vadd.f32 %v376_v57, %v2307_v8  ;;  %v582_v7 = vmul.f32 %v2240_v44, %v2390_v29  ;;  %v517_v9 = vmul.f32 0.01, %v453_v32 }
 0x128   :  { %626 = vadd.xlane.f32.xlu2 %v625_v61  ;;  %v452_v61 = vadd.f32 %v420_v49, %v2181_v50  ;;  %v425_v10 = vadd.f32 %v378_v63, %v2337_v53  ;;  %v580_v12 = vmul.f32 %v2240_v44, %v2393_v1  ;;  %vm485_vm9 = vcmp.gt.f32.partialorder %v453_v32, 0.0 }
 0x129   :  { %v518_v13 = vmul.f32 0.01, %v454_v58  ;;  %v423_v15 = vadd.f32 %v376_v57, %v2279_v39  ;;  %vm486_vm10 = vcmp.gt.f32.partialorder %v454_v58, 0.0  ;;  %v456_v8 = vadd.f32 %v424_v0, %v2181_v50 }
 0x12a   :  { %v516_v18 = vmul.f32 0.01, %v452_v61  ;;  %vm484_vm11 = vcmp.gt.f32.partialorder %v452_v61, 0.0  ;;  %v658_v25 = vsel %vm78_vm0, %v582_v7, 0.0  ;;  %v457_v53 = vadd.f32 %v425_v10, %v2166_v40 }
 0x12b   :  { %v652_v28 = vsel %vm78_vm0, %v580_v12, 0.0  ;;  %v455_v39 = vadd.f32 %v423_v15, %v2166_v40  ;;  %v427_v38 = vadd.f32 %v380_v6, %v311_v55  ;;  %v520_v43 = vmul.f32 0.01, %v456_v8 }
 0x12c   :  { %v2414_v60 = vsel %vm484_vm11, %v452_v61, %v516_v18  ;;  %vm488_vm12 = vcmp.gt.f32.partialorder %v456_v8, 0.0  ;;  %v521_v49 = vmul.f32 0.01, %v457_v53  ;;  %v426_v52 = vadd.f32 %v378_v63, %v2361_v22 }
 0x12d   :  { %v583_v48 = vmul.f32 %v2240_v44, %v2414_v60  ;;  %vm489_vm13 = vcmp.gt.f32.partialorder %v457_v53, 0.0  ;;  %vm487_vm14 = vcmp.gt.f32.partialorder %v455_v39, 0.0  ;;  %vm774_vm4 = vcmask 1041409  }
 0x12e   :  { %638 = vadd.xlane.f32.xlu0 %v637_v20  ;;  %641 = vadd.xlane.f32.xlu1 %v640_v24  ;;  %v655_v20 = vsel %vm78_vm0, %v581_v37, 0.0  ;;  %v2407_v24 = vsel %vm485_vm9, %v453_v32, %v517_v9  ;;  %v314_v31 = vpop.f32.mrf.mxu1  ;;  %v2430_v61 = vsel %vm489_vm13, %v457_v53, %v521_v49  ;;  %v458_v22 = vadd.f32 %v426_v52, %v2181_v50 }
 0x12f   :  { %v584_v35 = vmul.f32 %v2240_v44, %v2407_v24  ;;  %v428_v47 = vadd.f32 %v380_v6, %v314_v31  ;;  %v588_v0 = vmul.f32 %v2240_v44, %v2430_v61  ;;  %vm776_vm5 = vcmask 1042434  }
 0x130   :  { %635 = vadd.xlane.f32.xlu2 %v634_v14  ;;  %v2411_v14 = vsel %vm486_vm10, %v454_v58, %v518_v13  ;;  %v2426_v58 = vsel %vm488_vm12, %v456_v8, %v520_v43  ;;  %v522_v12 = vmul.f32 0.01, %v458_v22  ;;  %vm490_vm2 = vcmp.gt.f32.partialorder %v458_v22, 0.0 }
 0x131   :  { %v585_v41 = vmul.f32 %v2240_v44, %v2411_v14  ;;  %v664_v32 = vsel %vm78_vm0, %v584_v35, 0.0  ;;  %v460_v57 = vadd.f32 %v428_v47, %v2181_v50  ;;  %v587_v37 = vmul.f32 %v2240_v44, %v2426_v58 }
 0x132   :  { %v676_v15 = vsel %vm78_vm0, %v588_v0, 0.0  ;;  %vm778_vm6 = vcmask 1043459   ;;  %vm780_vm7 = vcmask 1044484   ;;  %vm782_vm8 = vcmask 1045509  }
 0x133   :  { %v667_v55 = vsel %vm78_vm0, %v585_v41, 0.0  ;;  %v524_v10 = vmul.f32 0.01, %v460_v57  ;;  %vm492_vm1 = vcmp.gt.f32.partialorder %v460_v57, 0.0  ;;  %v673_v13 = vsel %vm78_vm0, %v587_v37, 0.0 }
 0x134   :  { %vm784_vm9 = vcmask 1046534   ;;  %vm786_vm10 = vcmask 1047559   ;;  %vm3086_vm12 = vcmask 130048  }
 0x135   :  { %v2446_v8 = vsel %vm492_vm1, %v460_v57, %v524_v10 }
 0x136   :  { %647 = vadd.xlane.f32.xlu0 %v646_v54  ;;  %650 = vadd.xlane.f32.xlu1 %v649_v19  ;;  %v519_v54 = vmul.f32 0.01, %v455_v39  ;;  %v459_v19 = vadd.f32 %v427_v38, %v2166_v40  ;;  %v591_v6 = vmul.f32 %v2240_v44, %v2446_v8  ;;  %v1867_v38 = vpack.i.bf16 %v2166_v40, %v2181_v50 }
 0x138   :  { %644 = vadd.xlane.f32.xlu2 %v643_v59  ;;  %v661_v59 = vsel %vm78_vm0, %v583_v48, 0.0  ;;  %v2433_v63 = vsel %vm487_vm14, %v455_v39, %v519_v54  ;;  %v523_v7 = vmul.f32 0.01, %v459_v19  ;;  %vm491_vm15 = vcmp.gt.f32.partialorder %v459_v19, 0.0 }
 0x139   :  { %v586_v9 = vmul.f32 %v2240_v44, %v2433_v63  ;;  %v685_v31 = vsel %vm78_vm0, %v591_v6, 0.0 }
 0x13a   :  { %v2443_v18 = vsel %vm491_vm15, %v459_v19, %v523_v7 }
 0x13b   :  { %v590_v53 = vmul.f32 %v2240_v44, %v2443_v18 }
 0x13d   :  { %v682_v39 = vsel %vm78_vm0, %v590_v53, 0.0 }
 0x13e   :  { %656 = vadd.xlane.f32.xlu0 %v655_v20  ;;  %659 = vadd.xlane.f32.xlu1 %v658_v25  ;;  %v670_v20 = vsel %vm78_vm0, %v586_v9, 0.0  ;;  %v2448_v25 = vsel %vm490_vm2, %v458_v22, %v522_v12 }
 0x140   :  { %653 = vadd.xlane.f32.xlu2 %v652_v28  ;;  %v589_v28 = vmul.f32 %v2240_v44, %v2448_v25 }
 0x142   :  { %v679_v35 = vsel %vm78_vm0, %v589_v28, 0.0 }
 0x146   :  { %665 = vadd.xlane.f32.xlu0 %v664_v32  ;;  %668 = vadd.xlane.f32.xlu1 %v667_v55  ;;  %v722_v32 = vlaneseq }
 0x148   :  { %662 = vadd.xlane.f32.xlu2 %v661_v59  ;;  %v2462_v19 = vand.u32 127, %v722_v32 }
 0x14a   :  { %v2465_v22 = vadd.s32 4294967288, %v2462_v19 }
 0x14e   :  { %674 = vadd.xlane.f32.xlu0 %v673_v13  ;;  %677 = vadd.xlane.f32.xlu1 %v676_v15 }
 0x150   :  { %671 = vadd.xlane.f32.xlu2 %v670_v20 }
 0x156   :  { %683 = vadd.xlane.f32.xlu0 %v682_v39  ;;  %686 = vadd.xlane.f32.xlu1 %v685_v31 }
 0x158   :  { %680 = vadd.xlane.f32.xlu2 %v679_v35 }
 0x16f   :  { %1868 = vrot.lane.b32.xlu1 %v1867_v38, %s1960_s5 }
 0x179   :  { %v594_v41 = vpop.xlane.xlu1 %593 }
 0x17a   :  { %v724_v0 = vperm.slane %v594_v41, %v2462_v19 }
 0x17b   :  { %v597_v43 = vpop.xlane.xlu2 %596 }
 0x17c   :  { %v726_v7 = vperm.slane %v597_v43, %v2465_v22 }
 0x17e   :  { %v728_v31 = vsel %vm727_vm3, %v726_v7, %v724_v0 }
 0x181   :  { %v600_v47 = vpop.xlane.xlu0 %599  ;;  %v606_v48 = vpop.xlane.xlu1 %605 }
 0x182   :  { %v729_v40 = vperm.slane %v600_v47, %v2462_v19  ;;  %v732_v9 = vperm.slane %v606_v48, %v2462_v19 }
 0x183   :  { %v603_v44 = vpop.xlane.xlu2 %602 }
 0x184   :  { %v730_v50 = vperm.slane %v603_v44, %v2465_v22 }
 0x186   :  { %v731_v12 = vsel %vm727_vm3, %v730_v50, %v729_v40 }
 0x187   :  { %v775_v38 = vsel %vm774_vm4, %v731_v12, %v728_v31 }
 0x189   :  { %v612_v49 = vpop.xlane.xlu0 %611  ;;  %v615_v52 = vpop.xlane.xlu1 %614 }
 0x18a   :  { %v735_v13 = vperm.slane %v612_v49, %v2462_v19  ;;  %v736_v15 = vperm.slane %v615_v52, %v2465_v22 }
 0x18b   :  { %v609_v54 = vpop.xlane.xlu2 %608 }
 0x18c   :  { %v733_v37 = vperm.slane %v609_v54, %v2465_v22  ;;  %v737_v43 = vsel %vm727_vm3, %v736_v15, %v735_v13 }
 0x18e   :  { %v734_v53 = vsel %vm727_vm3, %v733_v37, %v732_v9 }
 0x18f   :  { %v777_v41 = vsel %vm776_vm5, %v734_v53, %v775_v38 }
 0x190   :  { %v779_v54 = vsel %vm778_vm6, %v737_v43, %v777_v41 }
 0x191   :  { %v621_v55 = vpop.xlane.xlu0 %620  ;;  %v624_v57 = vpop.xlane.xlu1 %623 }
 0x192   :  { %v739_v28 = vperm.slane %v621_v55, %v2465_v22  ;;  %v741_v47 = vperm.slane %v624_v57, %v2462_v19  ;;  %v2495_v57 = vld [vmem:[%s3077_s2] sm:$0xff] }
 0x193   :  { %v618_v59 = vpop.xlane.xlu2 %617  ;;  %vm688_vm11 = vcmp.gt.f32.partialorder %v2495_v57, 0.0 }
 0x194   :  { %v738_v6 = vperm.slane %v618_v59, %v2462_v19 }
 0x196   :  { %v740_v48 = vsel %vm727_vm3, %v739_v28, %v738_v6 }
 0x197   :  { %v781_v55 = vsel %vm780_vm7, %v740_v48, %v779_v54 }
 0x199   :  { %v630_v10 = vpop.xlane.xlu0 %629  ;;  %v633_v20 = vpop.xlane.xlu1 %632 }
 0x19a   :  { %v744_v44 = vperm.slane %v630_v10, %v2462_v19  ;;  %v745_v49 = vperm.slane %v633_v20, %v2465_v22 }
 0x19b   :  { %v627_v39 = vpop.xlane.xlu2 %626 }
 0x19c   :  { %v742_v35 = vperm.slane %v627_v39, %v2465_v22  ;;  %v746_v50 = vsel %vm727_vm3, %v745_v49, %v744_v44 }
 0x19e   :  { %v743_v52 = vsel %vm727_vm3, %v742_v35, %v741_v47 }
 0x19f   :  { %v783_v0 = vsel %vm782_vm8, %v743_v52, %v781_v55 }
 0x1a0   :  { %v785_v10 = vsel %vm784_vm9, %v746_v50, %v783_v0 }
 0x1a1   :  { %v639_v32 = vpop.xlane.xlu0 %638  ;;  %v642_v40 = vpop.xlane.xlu1 %641 }
 0x1a2   :  { %v748_v59 = vperm.slane %v639_v32, %v2465_v22  ;;  %v750_v32 = vperm.slane %v642_v40, %v2462_v19 }
 0x1a3   :  { %v636_v37 = vpop.xlane.xlu2 %635 }
 0x1a4   :  { %v747_v7 = vperm.slane %v636_v37, %v2462_v19 }
 0x1a6   :  { %v749_v9 = vsel %vm727_vm3, %v748_v59, %v747_v7 }
 0x1a7   :  { %v787_v12 = vsel %vm786_vm10, %v749_v9, %v785_v10 }
 0x1a8   :  { %v2506_v13 = vsel %vm688_vm11, %v787_v12, -1e+30 }
 0x1a9   :  { %v800_v15 = vsel %vm3086_vm12, %v2506_v13, -inf  ;;  %v648_v20 = vpop.xlane.xlu0 %647  ;;  %v651_v53 = vpop.xlane.xlu1 %650 }
 0x1aa   :  { %801 = vmax.xlane.f32.xlu2 %v800_v15  ;;  %v753_v47 = vperm.slane %v648_v20, %v2462_v19  ;;  %v754_v48 = vperm.slane %v651_v53, %v2465_v22 }
 0x1ab   :  { %v645_v6 = vpop.xlane.xlu2 %644 }
 0x1ac   :  { %v751_v43 = vperm.slane %v645_v6, %v2465_v22  ;;  %v755_v37 = vsel %vm727_vm3, %v754_v48, %v753_v47  ;;  %v2536_v47 = vld [vmem:[%s3077_s2 + $0x8] sm:$0xff] }
 0x1ad   :  { %vm3085_vm13 = vcmp.gt.f32.partialorder %v2536_v47, 0.0 }
 0x1ae   :  { %v752_v50 = vsel %vm727_vm3, %v751_v43, %v750_v32 }
 0x1af   :  { %v788_v20 = vsel %vm774_vm4, %v755_v37, %v752_v50 }
 0x1b1   :  { %v657_v28 = vpop.xlane.xlu0 %656  ;;  %v660_v39 = vpop.xlane.xlu1 %659 }
 0x1b2   :  { %v757_v52 = vperm.slane %v657_v28, %v2465_v22  ;;  %v759_v0 = vperm.slane %v660_v39, %v2462_v19 }
 0x1b3   :  { %v654_v31 = vpop.xlane.xlu2 %653 }
 0x1b4   :  { %v756_v49 = vperm.slane %v654_v31, %v2462_v19 }
 0x1b6   :  { %v758_v7 = vsel %vm727_vm3, %v757_v52, %v756_v49 }
 0x1b7   :  { %v789_v53 = vsel %vm776_vm5, %v758_v7, %v788_v20 }
 0x1b9   :  { %v666_v35 = vpop.xlane.xlu0 %665  ;;  %v669_v38 = vpop.xlane.xlu1 %668 }
 0x1ba   :  { %v762_v9 = vperm.slane %v666_v35, %v2462_v19  ;;  %v763_v10 = vperm.slane %v669_v38, %v2465_v22 }
 0x1bb   :  { %v663_v41 = vpop.xlane.xlu2 %662 }
 0x1bc   :  { %v760_v55 = vperm.slane %v663_v41, %v2465_v22  ;;  %v764_v39 = vsel %vm727_vm3, %v763_v10, %v762_v9  ;;  %v2553_v10 = vld [vmem:[%s3082_s7 + $0x18] sm:$0xff] }
 0x1be   :  { %v761_v12 = vsel %vm727_vm3, %v760_v55, %v759_v0 }
 0x1bf   :  { %v790_v28 = vsel %vm778_vm6, %v761_v12, %v789_v53  ;;  %v2558_v12 = vld [vmem:[%s3082_s7 + $0x10] sm:$0xff] }
 0x1c0   :  { %v791_v49 = vsel %vm780_vm7, %v764_v39, %v790_v28 }
 0x1c1   :  { %v675_v44 = vpop.xlane.xlu0 %674  ;;  %v678_v54 = vpop.xlane.xlu1 %677 }
 0x1c2   :  { %v766_v40 = vperm.slane %v675_v44, %v2465_v22  ;;  %v768_v48 = vperm.slane %v678_v54, %v2462_v19 }
 0x1c3   :  { %v672_v59 = vpop.xlane.xlu2 %671 }
 0x1c4   :  { %v765_v15 = vperm.slane %v672_v59, %v2462_v19 }
 0x1c6   :  { %v767_v38 = vsel %vm727_vm3, %v766_v40, %v765_v15  ;;  %v2564_v15 = vld [vmem:[%s3082_s7 + $0x8] sm:$0xff]  ;;  %v2570_v40 = vld [vmem:[%s3082_s7] sm:$0xff] }
 0x1c7   :  { %v792_v55 = vsel %vm782_vm8, %v767_v38, %v791_v49  ;;  %v1895_v38 = vld [vmem:[%s3076_s1] sm:$0xff] }
 0x1c9   :  { %v684_v6 = vpop.xlane.xlu0 %683  ;;  %v687_v35 = vpop.xlane.xlu1 %686 }
 0x1ca   :  { %v771_v31 = vperm.slane %v684_v6, %v2462_v19  ;;  %v772_v43 = vperm.slane %v687_v35, %v2465_v22  ;;  %v891_v35 = vmax.f32 %v2242_v46, 0.0  ;;  %v1897_v46 = vld [vmem:[%s3076_s1 + $0x10] sm:$0xff] }
 0x1cb   :  { %v681_v41 = vpop.xlane.xlu2 %680 }
 0x1cc   :  { %v769_v44 = vperm.slane %v681_v41, %v2465_v22  ;;  %v773_v52 = vsel %vm727_vm3, %v772_v43, %v771_v31  ;;  %v923_v41 = vadd.f32 %v1895_v38, %v891_v35  ;;  %v1896_v43 = vld [vmem:[%s3076_s1 + $0x8] sm:$0xff]  ;;  %v899_v35 = vmax.f32 %v2303_v5, 0.0  ;;  %v1905_v5 = vld [vmem:[%s3076_s1 + $0x50] sm:$0xff] }
 0x1ce   :  { %v770_v32 = vsel %vm727_vm3, %v769_v44, %v768_v48  ;;  %v893_v44 = vmax.f32 %v2260_v11, 0.0  ;;  %v895_v11 = vmax.f32 %v2256_v3, 0.0  ;;  %v1900_v3 = vld [vmem:[%s3076_s1 + $0x28] sm:$0xff] }
 0x1cf   :  { %v793_v59 = vsel %vm784_vm9, %v770_v32, %v792_v55 }
 0x1d0   :  { %v794_v50 = vsel %vm786_vm10, %v773_v52, %v793_v59  ;;  %v925_v49 = vadd.f32 %v1897_v46, %v893_v44  ;;  %v894_v52 = vmax.f32 %v2267_v16, 0.0  ;;  %v1898_v59 = vld [vmem:[%s3076_s1 + $0x18] sm:$0xff]  ;;  %v902_v44 = vmax.f32 %v2326_v36, 0.0 }
 0x1d1   :  { %v798_v37 = vsel %vm3085_vm13, %v794_v50, -1e+30  ;;  %v958_v36 = vld [vmem:[%s3081_s6 + $0x18] sm:$0xff] }
 0x1d2   :  { %v803_v54 = vsel %vm3086_vm12, %v798_v37, -inf  ;;  %v926_v50 = vadd.f32 %v1898_v59, %v894_v52  ;;  %v956_v59 = vld [vmem:[%s3081_s6 + $0x8] sm:$0xff] }
 0x1d3   :  { %804 = vmax.xlane.f32.xlu0 %v803_v54 }
 0x1e1   :  { %v1869_v0 = vpop.permute.xlu1 %1868 }
 0x1e2   :  { %v1870_v7 = vunpack.i.l.bf16 %v1869_v0  ;;  %v1871_v9 = vunpack.i.h.bf16 %v1869_v0  ;;  %v1899_v0 = vld [vmem:[%s3076_s1 + $0x20] sm:$0xff] }
 0x1e4   :  { %848 = vmatpush.msra.mxu2 %v1870_v7  ;;  %1856 = vmatpush.msra.mxu3 %v1870_v7  ;;  %v927_v7 = vadd.f32 %v1899_v0, %v895_v11  ;;  %v1909_v0 = vld [vmem:[%s3076_s1 + $0x70] sm:$0xff] }
 0x1e6   :  { %849 = vmatpush.msra.mxu2 %v1871_v9  ;;  %1857 = vmatpush.msra.mxu3 %v1871_v9  ;;  %v896_v9 = vmax.f32 %v2282_v42, 0.0  ;;  %v1902_v42 = vld [vmem:[%s3076_s1 + $0x38] sm:$0xff] }
 0x1e8   :  { %1101 = vmatpush.msrb.mxu2 %v2553_v10  ;;  %982 = vmatpush.msrb.mxu3 %v958_v36 }
 0x1ea   :  { %1102 = vmatpush.msrb.mxu2 %v2558_v12 }
 0x1ec   :  { %1103 = vmatpush.msrb.mxu2 %v2564_v15 }
 0x1ee   :  { %1104 = vmatpush.msrb.mxu2 %v2570_v40 }
 0x21d   :  { %v802_v20 = vpop.xlane.xlu2 %801 }
 0x21e   :  { %v806_v53 = vsub.f32 %v2506_v13, %v802_v20  ;;  %v892_v13 = vmax.f32 %v2246_v51, 0.0  ;;  %v928_v20 = vadd.f32 %v1900_v3, %v896_v9 }
 0x220   :  { %v808_v6 = vmul.f32 1.442695, %v806_v53  ;;  %v924_v48 = vadd.f32 %v1896_v43, %v892_v13  ;;  %v897_v53 = vmax.f32 %v2276_v26, 0.0  ;;  %v1903_v26 = vld [vmem:[%s3076_s1 + $0x40] sm:$0xff]  ;;  %v901_v43 = vmax.f32 %v2300_v4, 0.0 }
 0x221   :  { %v931_v38 = vadd.f32 %v1903_v26, %v899_v35  ;;  %v1907_v4 = vld [vmem:[%s3076_s1 + $0x60] sm:$0xff] }
 0x222   :  { %1879 = vpow2.f32 %v808_v6  ;;  %v1901_v6 = vld [vmem:[%s3076_s1 + $0x30] sm:$0xff]  ;;  %v1912_v26 = vld [vmem:[%s3075_s0] sm:$0xff] }
 0x228   :  { %v1880_v28 = vpop.eup %1879 }
 0x229   :  { %v812_v39 = vmul.f32 %v1880_v28, %v2495_v57  ;;  %v929_v28 = vadd.f32 %v1901_v6, %v897_v53 }
 0x22b   :  { %1814 = vmatmul.msk.f32.vlgmr.msra.gmra.mxu2 %vm3086_vm12, %v812_v39  ;;  %v814_v31 = vsel %vm3086_vm12, %v812_v39, 0.0  ;;  %v898_v39 = vmax.f32 %v2286_v45, 0.0  ;;  %v1904_v45 = vld [vmem:[%s3076_s1 + $0x48] sm:$0xff] }
 0x22c   :  { %815 = vadd.xlane.f32.xlu2 %v814_v31 }
 0x22d   :  { %v930_v31 = vadd.f32 %v1902_v42, %v898_v39 }
 0x233   :  { %1818 = vmatmul.msk.f32.vlgmr.msrb.gmra.mxu2 %vm78_vm0, %v923_v41  ;;  %v900_v41 = vmax.f32 %v2296_v62, 0.0  ;;  %v1906_v62 = vld [vmem:[%s3076_s1 + $0x58] sm:$0xff] }
 0x234   :  { %v934_v46 = vadd.f32 %v1906_v62, %v902_v44 }
 0x235   :  { %v932_v13 = vadd.f32 %v1904_v45, %v900_v41 }
 0x23b   :  { %1819 = vmatmul.msk.f32.gmra.mxu2 %vm78_vm0, %v924_v48  ;;  %v933_v48 = vadd.f32 %v1905_v5, %v901_v43 }
 0x243   :  { %1820 = vmatmul.msk.f32.gmra.mxu2 %vm78_vm0, %v925_v49  ;;  %v903_v49 = vmax.f32 %v2319_v30, 0.0  ;;  %v1908_v30 = vld [vmem:[%s3076_s1 + $0x68] sm:$0xff] }
 0x245   :  { %v935_v52 = vadd.f32 %v1907_v4, %v903_v49 }
 0x246   :  { %v805_v32 = vpop.xlane.xlu0 %804 }
 0x247   :  { %v807_v51 = vsub.f32 %v798_v37, %v805_v32  ;;  %v904_v32 = vmax.f32 %v2323_v34, 0.0  ;;  %v955_v34 = vld [vmem:[%s3081_s6] sm:$0xff] }
 0x249   :  { %v810_v55 = vmul.f32 1.442695, %v807_v51  ;;  %v957_v51 = vld [vmem:[%s3081_s6 + $0x10] sm:$0xff]  ;;  %s1962_s6 = smov 128  }
 0x24a   :  { %983 = vmatpush.msrb.mxu3 %v957_v51 }
 0x24b   :  { %1881 = vpow2.f32 %v810_v55  ;;  %1821 = vmatmul.msk.f32.gmra.mxu2 %vm78_vm0, %v926_v50  ;;  %v936_v55 = vadd.f32 %v1908_v30, %v904_v32  ;;  %v905_v50 = vmax.f32 %v2349_v2, 0.0  ;;  %v1913_v30 = vld [vmem:[%s3075_s0 + $0x8] sm:$0xff] }
 0x24c   :  { %984 = vmatpush.msrb.mxu3 %v956_v59  ;;  %v908_v59 = vmax.f32 %v2372_v33, 0.0  ;;  %v1916_v33 = vld [vmem:[%s3076_s1 + $0x98] sm:$0xff] }
 0x24e   :  { %985 = vmatpush.msrb.mxu3 %v955_v34  ;;  %v1914_v34 = vld [vmem:[%s3076_s1 + $0x88] sm:$0xff] }
 0x251   :  { %v1882_v54 = vpop.eup %1881 }
 0x252   :  { %v813_v16 = vmul.f32 %v1882_v54, %v2536_v47 }
 0x253   :  { %1822 = vmatmul.msk.f32.gmra.mxu2 %vm78_vm0, %v927_v7  ;;  %v937_v7 = vadd.f32 %v1909_v0, %v905_v50  ;;  %v940_v50 = vadd.f32 %v1914_v34, %v908_v59 }
 0x254   :  { %1815 = vmatmul.msk.f32.vlgmr.msra.gmra.mxu3 %vm3086_vm12, %v813_v16  ;;  %v817_v37 = vsel %vm3086_vm12, %v813_v16, 0.0  ;;  %v906_v16 = vmax.f32 %v2342_v21, 0.0 }
 0x255   :  { %818 = vadd.xlane.f32.xlu0 %v817_v37  ;;  %1858 = vmatpush.msra.mxu3 %v2553_v10  ;;  %v1910_v10 = vld [vmem:[%s3076_s1 + $0x78] sm:$0xff] }
 0x256   :  { %v938_v37 = vadd.f32 %v1910_v10, %v906_v16 }
 0x257   :  { %1859 = vmatpush.msra.mxu3 %v2558_v12 }
 0x259   :  { %1860 = vmatpush.msra.mxu3 %v2564_v15 }
 0x25b   :  { %1823 = vmatmul.msk.f32.gmra.mxu2 %vm78_vm0, %v928_v20  ;;  %1861 = vmatpush.msra.mxu3 %v2570_v40  ;;  %v907_v20 = vmax.f32 %v2346_v17, 0.0 }
 0x263   :  { %1824 = vmatmul.msk.f32.gmra.mxu2 %vm78_vm0, %v929_v28  ;;  %v1911_v28 = vld [vmem:[%s3076_s1 + $0x80] sm:$0xff] }
 0x264   :  { %v939_v39 = vadd.f32 %v1911_v28, %v907_v20  ;;  %v914_v20 = vmax.f32 %v2414_v60, 0.0  ;;  %v1922_v60 = vld [vmem:[%s3076_s1 + $0xc8] sm:$0xff] }
 0x26b   :  { %1825 = vmatmul.msk.f32.gmra.mxu2 %vm78_vm0, %v930_v31 }
 0x273   :  { %1826 = vmatmul.msk.f32.gmra.mxu2 %vm78_vm0, %v931_v38 }
 0x27b   :  { %1827 = vmatmul.msk.f32.gmra.mxu2 %vm78_vm0, %v932_v13 }
 0x283   :  { %1828 = vmatmul.msk.f32.gmra.mxu2 %vm78_vm0, %v933_v48 }
 0x28b   :  { %1829 = vmatmul.msk.f32.gmra.mxu2 %vm78_vm0, %v934_v46 }
 0x293   :  { %1830 = vmatmul.msk.f32.gmra.mxu2 %vm78_vm0, %v935_v52 }
 0x29b   :  { %1831 = vmatmul.msk.f32.gmra.mxu2 %vm78_vm0, %v936_v55 }
 0x29f   :  { %v816_v11 = vpop.xlane.xlu2 %815 }
 0x2a0   :  { %v820_v54 = vmax.f32 %v816_v11, 1e-20  ;;  %v909_v11 = vmax.f32 %v2365_v27, 0.0  ;;  %v1917_v27 = vld [vmem:[%s3076_s1 + $0xa0] sm:$0xff] }
 0x2a2   :  { %1883 = vrcp.f32 %v820_v54  ;;  %v868_v12 = vand.u32 2147483648, %v820_v54  ;;  %v866_v15 = vand.u32 2147483647, %v820_v54  ;;  %vm862_vm15 = vweird.f32 %v820_v54 }
 0x2a3   :  { %1832 = vmatmul.msk.f32.gmra.mxu2 %vm78_vm0, %v937_v7  ;;  %v910_v7 = vmax.f32 %v2369_v23, 0.0  ;;  %v1918_v23 = vld [vmem:[%s3076_s1 + $0xa8] sm:$0xff] }
 0x2a4   :  { %v869_v21 = vor.u32 1.1754944e-38, %v868_v12  ;;  %vm867_vm2 = vcmp.eq.f32.partialorder %v866_v15, 8.507059e+37  ;;  %v915_v15 = vmax.f32 %v2407_v24, 0.0  ;;  %v917_v24 = vmax.f32 %v2433_v63, 0.0 }
 0x2a5   :  { %v942_v16 = vadd.f32 %v1916_v33, %v910_v7  ;;  %v919_v63 = vmax.f32 %v2430_v61, 0.0 }
 0x2a8   :  { %v1884_v2 = vpop.eup %1883 }
 0x2a9   :  { %v858_v9 = vmul.f32 %v1884_v2, %v820_v54  ;;  %vm863_vm14 = vweird.f32 %v1884_v2  ;;  %v1915_v54 = vld [vmem:[%s3076_s1 + $0x90] sm:$0xff] }
 0x2aa   :  { %vm864_vm1 = vmor %vm862_vm15, %vm863_vm14  ;;  %v941_v0 = vadd.f32 %v1915_v54, %v909_v11  ;;  %v1927_v11 = vld [vmem:[%s3076_s1 + $0xf0] sm:$0xff] }
 0x2ab   :  { %1833 = vmatmul.msk.f32.gmra.mxu2 %vm78_vm0, %v938_v37  ;;  %v859_v3 = vsub.f32 1.0, %v858_v9  ;;  %v912_v37 = vmax.f32 %v2386_v56, 0.0  ;;  %v1920_v56 = vld [vmem:[%s3076_s1 + $0xb8] sm:$0xff] }
 0x2ad   :  { %v860_v53 = vmul.f32 %v1884_v2, %v859_v3  ;;  %v944_v9 = vadd.f32 %v1918_v23, %v912_v37  ;;  %v913_v3 = vmax.f32 %v2390_v29, 0.0  ;;  %v1921_v29 = vld [vmem:[%s3076_s1 + $0xc0] sm:$0xff] }
 0x2ae   :  { %v851_v42 = vpop.f32.mrf.mxu2 }
 0x2af   :  { %v861_v6 = vadd.f32 %v1884_v2, %v860_v53  ;;  %v946_v53 = vadd.f32 %v1920_v56, %v914_v20 }
 0x2b1   :  { %v865_v40 = vsel %vm864_vm1, %v1884_v2, %v861_v6  ;;  %v911_v2 = vmax.f32 %v2393_v1, 0.0  ;;  %v1919_v1 = vld [vmem:[%s3076_s1 + $0xb0] sm:$0xff]  ;;  %v947_v6 = vadd.f32 %v1921_v29, %v915_v15 }
 0x2b2   :  { %v870_v31 = vsel %vm867_vm2, %v869_v21, %v865_v40  ;;  %v945_v12 = vadd.f32 %v1919_v1, %v913_v3  ;;  %v916_v21 = vmax.f32 %v2411_v14, 0.0  ;;  %v918_v14 = vmax.f32 %v2426_v58, 0.0 }
 0x2b3   :  { %v871_v35 = vmul.f32 %v870_v31, %v851_v42  ;;  %1834 = vmatmul.msk.f32.gmra.mxu2 %vm78_vm0, %v939_v39  ;;  %v943_v10 = vadd.f32 %v1917_v27, %v911_v2  ;;  %v1923_v39 = vld [vmem:[%s3076_s1 + $0xd0] sm:$0xff] }
 0x2b4   :  { %v948_v28 = vadd.f32 %v1922_v60, %v916_v21  ;;  %v949_v42 = vadd.f32 %v1923_v39, %v917_v24 }
 0x2b5   :  { %v887_v17 = vmax.f32 %v871_v35, 0.0  ;;  %v1924_v35 = vld [vmem:[%s3076_s1 + $0xd8] sm:$0xff] }
 0x2b6   :  { %v2731_v40 = vpop.f32.mrf.mxu2 }
 0x2b7   :  { %v889_v38 = vadd.f32 %v1912_v26, %v887_v17  ;;  %v950_v17 = vadd.f32 %v1924_v35, %v918_v14 }
 0x2b9   :  { %1816 = vmatmul.msk.f32.vlgmr.msrb.gmra.mxu3 %vm78_vm0, %v889_v38 }
 0x2be   :  { %v2741_v31 = vpop.f32.mrf.mxu2 }
 0x2c6   :  { %v2750_v26 = vpop.f32.mrf.mxu2 }
 0x2c8   :  { %v819_v41 = vpop.xlane.xlu0 %818 }
 0x2c9   :  { %v821_v45 = vmax.f32 %v819_v41, 1e-20 }
 0x2cb   :  { %1885 = vrcp.f32 %v821_v45  ;;  %v883_v48 = vand.u32 2147483648, %v821_v45  ;;  %v881_v62 = vand.u32 2147483647, %v821_v45  ;;  %vm877_vm15 = vweird.f32 %v821_v45 }
 0x2cd   :  { %v884_v49 = vor.u32 1.1754944e-38, %v883_v48  ;;  %vm882_vm2 = vcmp.eq.f32.partialorder %v881_v62, 8.507059e+37 }
 0x2d1   :  { %v1886_v13 = vpop.eup %1885 }
 0x2d2   :  { %v873_v43 = vmul.f32 %v1886_v13, %v821_v45  ;;  %vm878_vm14 = vweird.f32 %v1886_v13 }
 0x2d3   :  { %vm879_vm1 = vmor %vm877_vm15, %vm878_vm14 }
 0x2d4   :  { %v874_v5 = vsub.f32 1.0, %v873_v43 }
 0x2d6   :  { %v875_v44 = vmul.f32 %v1886_v13, %v874_v5  ;;  %v1925_v5 = vld [vmem:[%s3076_s1 + $0xe0] sm:$0xff] }
 0x2d7   :  { %v854_v52 = vpop.f32.mrf.mxu3  ;;  %v951_v48 = vadd.f32 %v1925_v5, %v919_v63 }
 0x2d8   :  { %v876_v46 = vadd.f32 %v1886_v13, %v875_v44 }
 0x2da   :  { %v880_v4 = vsel %vm879_vm1, %v1886_v13, %v876_v46  ;;  %v920_v46 = vmax.f32 %v2448_v25, 0.0 }
 0x2db   :  { %v885_v32 = vsel %vm882_vm2, %v884_v49, %v880_v4  ;;  %v2768_v4 = vpop.f32.mrf.mxu2 }
 0x2dc   :  { %v886_v36 = vmul.f32 %v885_v32, %v854_v52 }
 0x2de   :  { %v888_v51 = vmax.f32 %v886_v36, 0.0  ;;  %v1926_v36 = vld [vmem:[%s3076_s1 + $0xe8] sm:$0xff] }
 0x2e0   :  { %v890_v55 = vadd.f32 %v1913_v30, %v888_v51  ;;  %v952_v51 = vadd.f32 %v1926_v36, %v920_v46 }
 0x2e2   :  { %1817 = vmatmul.msk.f32.gmra.mxu3 %vm78_vm0, %v890_v55  ;;  %v921_v55 = vmax.f32 %v2443_v18, 0.0  ;;  %v1928_v18 = vld [vmem:[%s3076_s1 + $0xf8] sm:$0xff] }
 0x2e4   :  { %v953_v54 = vadd.f32 %v1927_v11, %v921_v55 }
 0x2ea   :  { %1835 = vmatmul.msk.f32.vlgmr.msra.gmra.mxu3 %vm78_vm0, %v940_v50  ;;  %v2780_v50 = vpop.f32.mrf.mxu2 }
 0x2f2   :  { %1836 = vmatmul.msk.f32.gmra.mxu3 %vm78_vm0, %v941_v0  ;;  %v922_v0 = vmax.f32 %v2446_v8, 0.0  ;;  %v2792_v33 = vpop.f32.mrf.mxu2 }
 0x2f4   :  { %v954_v7 = vadd.f32 %v1928_v18, %v922_v0 }
 0x2fa   :  { %1837 = vmatmul.msk.f32.gmra.mxu3 %vm78_vm0, %v942_v16  ;;  %v2795_v16 = vpop.f32.mrf.mxu2 }
 0x302   :  { %1838 = vmatmul.msk.f32.gmra.mxu3 %vm78_vm0, %v943_v10  ;;  %v2810_v20 = vpop.f32.mrf.mxu2 }
 0x30a   :  { %1839 = vmatmul.msk.f32.gmra.mxu3 %vm78_vm0, %v944_v9 }
 0x312   :  { %1840 = vmatmul.msk.f32.gmra.mxu3 %vm78_vm0, %v945_v12 }
 0x31a   :  { %1841 = vmatmul.msk.f32.gmra.mxu3 %vm78_vm0, %v946_v53 }
 0x322   :  { %1842 = vmatmul.msk.f32.gmra.mxu3 %vm78_vm0, %v947_v6 }
 0x32a   :  { %1843 = vmatmul.msk.f32.gmra.mxu3 %vm78_vm0, %v948_v28  ;;  %v2819_v28 = vpop.f32.mrf.mxu2 }
 0x332   :  { %1844 = vmatmul.msk.f32.gmra.mxu3 %vm78_vm0, %v949_v42  ;;  %v1133_v42 = vpop.f32.mrf.mxu2 }
 0x33a   :  { %1845 = vmatmul.msk.f32.gmra.mxu3 %vm78_vm0, %v950_v17  ;;  %v1136_v35 = vpop.f32.mrf.mxu2 }
 0x33c   :  { %v2752_v38 = vpop.f32.mrf.mxu3 }
 0x33d   :  { %v1218_v41 = vperm.slane %v2752_v38, 0  ;;  %v1205_v45 = vrot.slane %v2752_v38, 2  ;;  %v1204_v13 = vrot.slane %v2752_v38, 1  ;;  %v1208_v61 = vrot.slane %v2752_v38, 5 }
 0x33e   :  { %v1206_v44 = vrot.slane %v2752_v38, 3  ;;  %v1207_v62 = vrot.slane %v2752_v38, 4  ;;  %v1209_v25 = vrot.slane %v2752_v38, 6  ;;  %v1210_v30 = vrot.slane %v2752_v38, 7 }
 0x33f   :  { %1234 = vrot.lane.b32.xlu2 %v1218_v41, %s1959_s22  ;;  %v1220_v58 = vperm.slane %v1205_v45, 0  ;;  %v1219_v43 = vperm.slane %v1204_v13, 0  ;;  %v1223_v49 = vperm.slane %v1208_v61, 0 }
 0x340   :  { %v1221_v52 = vperm.slane %v1206_v44, 0  ;;  %v1222_v32 = vperm.slane %v1207_v62, 0  ;;  %v1224_v59 = vperm.slane %v1209_v25, 0  ;;  %v1225_v34 = vperm.slane %v1210_v30, 0 }
 0x341   :  { %1238 = vrot.lane.b32.xlu1 %v1220_v58, %s1959_s22  ;;  %1236 = vrot.lane.b32.xlu0 %v1219_v43, %s1959_s22 }
 0x342   :  { %1846 = vmatmul.msk.f32.gmra.mxu3 %vm78_vm0, %v951_v48  ;;  %v2829_v63 = vpop.f32.mrf.mxu2  ;;  %v2840_v48 = vld [vmem:[%s3083_s8] ss:$0 sm:$0xff] }
 0x347   :  { %1244 = vrot.lane.b32.xlu2 %v1223_v49, %s1959_s22 }
 0x349   :  { %1240 = vrot.lane.b32.xlu1 %v1221_v52, %s1959_s22  ;;  %1242 = vrot.lane.b32.xlu0 %v1222_v32, %s1959_s22 }
 0x34a   :  { %1847 = vmatmul.msk.f32.gmra.mxu3 %vm78_vm0, %v952_v51  ;;  %v2842_v62 = vpop.f32.mrf.mxu2 }
 0x351   :  { %1246 = vrot.lane.b32.xlu1 %v1224_v59, %s1959_s22  ;;  %1248 = vrot.lane.b32.xlu0 %v1225_v34, %s1959_s22 }
 0x352   :  { %1848 = vmatmul.msk.f32.gmra.mxu3 %vm78_vm0, %v953_v54  ;;  %v2850_v51 = vpop.f32.mrf.mxu2 }
 0x35a   :  { %1849 = vmatmul.msk.f32.gmra.mxu3 %vm78_vm0, %v954_v7  ;;  %v2854_v59 = vpop.f32.mrf.mxu2 }
 0x365   :  { %v2797_v2 = vpop.f32.mrf.mxu3 }
 0x366   :  { %v1226_v27 = vperm.slane %v2797_v2, 0  ;;  %v1212_v10 = vrot.slane %v2797_v2, 2  ;;  %v1211_v37 = vrot.slane %v2797_v2, 1  ;;  %v1213_v9 = vrot.slane %v2797_v2, 3 }
 0x367   :  { %v1215_v3 = vrot.slane %v2797_v2, 5  ;;  %v1214_v1 = vrot.slane %v2797_v2, 4  ;;  %v1216_v29 = vrot.slane %v2797_v2, 6  ;;  %v1217_v6 = vrot.slane %v2797_v2, 7 }
 0x368   :  { %1250 = vrot.lane.b32.xlu2 %v1226_v27, %s1959_s22  ;;  %v1228_v8 = vperm.slane %v1212_v10, 0  ;;  %v1227_v23 = vperm.slane %v1211_v37, 0  ;;  %v1229_v56 = vperm.slane %v1213_v9, 0 }
 0x369   :  { %v1231_v53 = vperm.slane %v1215_v3, 0  ;;  %v1230_v15 = vperm.slane %v1214_v1, 0  ;;  %v1232_v60 = vperm.slane %v1216_v29, 0  ;;  %v1233_v24 = vperm.slane %v1217_v6, 0 }
 0x36a   :  { %1254 = vrot.lane.b32.xlu0 %v1228_v8, %s1959_s22  ;;  %1252 = vrot.lane.b32.xlu1 %v1227_v23, %s1959_s22 }
 0x36d   :  { %v2808_v12 = vpop.f32.mrf.mxu3 }
 0x370   :  { %1256 = vrot.lane.b32.xlu2 %v1229_v56, %s1959_s22 }
 0x372   :  { %1260 = vrot.lane.b32.xlu0 %v1231_v53, %s1959_s22  ;;  %1258 = vrot.lane.b32.xlu1 %v1230_v15, %s1959_s22 }
 0x375   :  { %v2817_v21 = vpop.f32.mrf.mxu3 }
 0x378   :  { %1262 = vrot.lane.b32.xlu2 %v1232_v60, %s1959_s22 }
 0x37a   :  { %1264 = vrot.lane.b32.xlu1 %v1233_v24, %s1959_s22 }
 0x37d   :  { %v2823_v39 = vpop.f32.mrf.mxu3 }
 0x385   :  { %v2825_v14 = vpop.f32.mrf.mxu3 }
 0x38d   :  { %v2827_v17 = vpop.f32.mrf.mxu3 }
 0x395   :  { %v2831_v41 = vpop.f32.mrf.mxu3 }
 0x399   :  { %v1235_v45 = vpop.permute.xlu2 %1234 }
 0x39a   :  { %v1282_v13 = vadd.f32 %v1235_v45, %v2731_v40  ;;  %v1283_v58 = vadd.f32 %v1235_v45, %v2741_v31 }
 0x39c   :  { %v1314_v43 = vadd.f32 %v1282_v13, %v2752_v38  ;;  %v1315_v5 = vadd.f32 %v1283_v58, %v2797_v2 }
 0x39d   :  { %v2846_v52 = vpop.f32.mrf.mxu3 }
 0x39e   :  { %vm1347_vm14 = vcmp.gt.f32.partialorder %v1315_v5, 0.0  ;;  %v1379_v61 = vmul.f32 0.01, %v1315_v5  ;;  %vm1346_vm15 = vcmp.gt.f32.partialorder %v1314_v43, 0.0  ;;  %v1378_v44 = vmul.f32 0.01, %v1314_v43 }
 0x3a0   :  { %v1411_v46 = vsel %vm1347_vm14, %v1315_v5, %v1379_v61  ;;  %v1410_v49 = vsel %vm1346_vm15, %v1314_v43, %v1378_v44  ;;  %v1151_v43 = vpop.f32.mrf.mxu2 }
 0x3a1   :  { %v1446_v40 = vmul.f32 %v2840_v48, %v1411_v46  ;;  %v1445_v31 = vmul.f32 %v2840_v48, %v1410_v49  ;;  %v1245_v37 = vpop.permute.xlu2 %1244 }
 0x3a3   :  { %v1480_v32 = vsel %vm78_vm0, %v1446_v40, 0.0  ;;  %v1477_v36 = vsel %vm78_vm0, %v1445_v31, 0.0  ;;  %v1293_v40 = vadd.f32 %v1245_v37, %v2829_v63 }
 0x3a4   :  { %1481 = vadd.xlane.f32.xlu2 %v1480_v32  ;;  %1478 = vadd.xlane.f32.xlu0 %v1477_v36 }
 0x3a5   :  { %v2852_v25 = vpop.f32.mrf.mxu3 }
 0x3ad   :  { %v2864_v8 = vpop.f32.mrf.mxu3 }
 0x3b3   :  { %v1239_v30 = vpop.permute.xlu1 %1238  ;;  %v1237_v55 = vpop.permute.xlu0 %1236 }
 0x3b4   :  { %v1286_v34 = vadd.f32 %v1239_v30, %v2780_v50  ;;  %v1287_v11 = vadd.f32 %v1239_v30, %v2792_v33  ;;  %v1284_v54 = vadd.f32 %v1237_v55, %v2750_v26  ;;  %v1285_v0 = vadd.f32 %v1237_v55, %v2768_v4 }
 0x3b5   :  { %v1292_v26 = vadd.f32 %v1245_v37, %v1136_v35  ;;  %v2882_v31 = vpop.f32.mrf.mxu3 }
 0x3b6   :  { %v1318_v18 = vadd.f32 %v1286_v34, %v2752_v38  ;;  %v1319_v7 = vadd.f32 %v1287_v11, %v2797_v2  ;;  %v1316_v27 = vadd.f32 %v1284_v54, %v2752_v38  ;;  %v1317_v10 = vadd.f32 %v1285_v0, %v2797_v2 }
 0x3b7   :  { %v1324_v5 = vadd.f32 %v1292_v26, %v2752_v38 }
 0x3b8   :  { %vm1350_vm1 = vcmp.gt.f32.partialorder %v1318_v18, 0.0  ;;  %v1382_v23 = vmul.f32 0.01, %v1318_v18  ;;  %vm1349_vm2 = vcmp.gt.f32.partialorder %v1317_v10, 0.0  ;;  %v1381_v50 = vmul.f32 0.01, %v1317_v10 }
 0x3b9   :  { %vm1348_vm14 = vcmp.gt.f32.partialorder %v1316_v27, 0.0  ;;  %v1380_v33 = vmul.f32 0.01, %v1316_v27  ;;  %vm1351_vm15 = vcmp.gt.f32.partialorder %v1319_v7, 0.0  ;;  %v1383_v29 = vmul.f32 0.01, %v1319_v7 }
 0x3ba   :  { %v1414_v9 = vsel %vm1350_vm1, %v1318_v18, %v1382_v23  ;;  %v1413_v4 = vsel %vm1349_vm2, %v1317_v10, %v1381_v50  ;;  %v1388_v30 = vmul.f32 0.01, %v1324_v5 }
 0x3bb   :  { %v1241_v3 = vpop.permute.xlu1 %1240  ;;  %v1243_v1 = vpop.permute.xlu0 %1242  ;;  %v1449_v56 = vmul.f32 %v2840_v48, %v1414_v9  ;;  %v1448_v53 = vmul.f32 %v2840_v48, %v1413_v4  ;;  %v1412_v15 = vsel %vm1348_vm14, %v1316_v27, %v1380_v33  ;;  %vm1356_vm14 = vcmp.gt.f32.partialorder %v1324_v5, 0.0 }
 0x3bc   :  { %v1288_v6 = vadd.f32 %v1241_v3, %v2795_v16  ;;  %v1289_v60 = vadd.f32 %v1241_v3, %v2810_v20  ;;  %v1290_v24 = vadd.f32 %v1243_v1, %v2819_v28  ;;  %v1291_v45 = vadd.f32 %v1243_v1, %v1133_v42 }
 0x3bd   :  { %v1489_v35 = vsel %vm78_vm0, %v1449_v56, 0.0  ;;  %v1486_v13 = vsel %vm78_vm0, %v1448_v53, 0.0  ;;  %v1447_v58 = vmul.f32 %v2840_v48, %v1412_v15  ;;  %v1415_v42 = vsel %vm1351_vm15, %v1319_v7, %v1383_v29  ;;  %v2898_v29 = vpop.f32.mrf.mxu3 }
 0x3be   :  { %v1320_v61 = vadd.f32 %v1288_v6, %v2752_v38  ;;  %v1321_v44 = vadd.f32 %v1289_v60, %v2797_v2  ;;  %1490 = vadd.xlane.f32.xlu2 %v1489_v35  ;;  %v1322_v16 = vadd.f32 %v1290_v24, %v2752_v38  ;;  %v1323_v20 = vadd.f32 %v1291_v45, %v2797_v2 }
 0x3bf   :  { %1487 = vadd.xlane.f32.xlu0 %v1486_v13  ;;  %v1483_v28 = vsel %vm78_vm0, %v1447_v58, 0.0  ;;  %v1450_v54 = vmul.f32 %v2840_v48, %v1415_v42  ;;  %v1420_v50 = vsel %vm1356_vm14, %v1324_v5, %v1388_v30  ;;  %v1325_v9 = vadd.f32 %v1293_v40, %v2797_v2 }
 0x3c0   :  { %1484 = vadd.xlane.f32.xlu1 %v1483_v28  ;;  %vm1353_vm1 = vcmp.gt.f32.partialorder %v1321_v44, 0.0  ;;  %v1385_v46 = vmul.f32 0.01, %v1321_v44  ;;  %vm1352_vm2 = vcmp.gt.f32.partialorder %v1320_v61, 0.0  ;;  %v1384_v49 = vmul.f32 0.01, %v1320_v61 }
 0x3c1   :  { %v1387_v0 = vmul.f32 0.01, %v1323_v20  ;;  %vm1355_vm15 = vcmp.gt.f32.partialorder %v1323_v20, 0.0  ;;  %v1386_v63 = vmul.f32 0.01, %v1322_v16  ;;  %v1455_v56 = vmul.f32 %v2840_v48, %v1420_v50 }
 0x3c2   :  { %v1417_v32 = vsel %vm1353_vm1, %v1321_v44, %v1385_v46  ;;  %v1416_v36 = vsel %vm1352_vm2, %v1320_v61, %v1384_v49  ;;  %vm1354_vm1 = vcmp.gt.f32.partialorder %v1322_v16, 0.0  ;;  %v1251_v37 = vpop.permute.xlu2 %1250  ;;  %v1389_v35 = vmul.f32 0.01, %v1325_v9 }
 0x3c3   :  { %v1247_v55 = vpop.permute.xlu1 %1246  ;;  %v1452_v34 = vmul.f32 %v2840_v48, %v1417_v32  ;;  %v1451_v11 = vmul.f32 %v2840_v48, %v1416_v36  ;;  %v1419_v26 = vsel %vm1355_vm15, %v1323_v20, %v1387_v0  ;;  %v1249_v4 = vpop.permute.xlu0 %1248  ;;  %v1418_v3 = vsel %vm1354_vm1, %v1322_v16, %v1386_v63 }
 0x3c4   :  { %v1294_v18 = vadd.f32 %v1247_v55, %v2842_v62  ;;  %v1295_v7 = vadd.f32 %v1247_v55, %v2850_v51  ;;  %v1492_v62 = vsel %vm78_vm0, %v1450_v54, 0.0  ;;  %v1154_v51 = vpop.f32.mrf.mxu2  ;;  %v1454_v53 = vmul.f32 %v2840_v48, %v1419_v26 }
 0x3c5   :  { %v1498_v27 = vsel %vm78_vm0, %v1452_v34, 0.0  ;;  %v1495_v10 = vsel %vm78_vm0, %v1451_v11, 0.0  ;;  %v1298_v1 = vadd.f32 %v1251_v37, %v1154_v51  ;;  %v1297_v6 = vadd.f32 %v1249_v4, %v1151_v43  ;;  %v2912_v30 = vpop.f32.mrf.mxu3 }
 0x3c6   :  { %v1327_v23 = vadd.f32 %v1295_v7, %v2797_v2  ;;  %1499 = vadd.xlane.f32.xlu2 %v1498_v27  ;;  %v1326_v33 = vadd.f32 %v1294_v18, %v2752_v38  ;;  %v1453_v60 = vmul.f32 %v2840_v48, %v1418_v3  ;;  %v1296_v45 = vadd.f32 %v1249_v4, %v2854_v59 }
 0x3c7   :  { %1496 = vadd.xlane.f32.xlu0 %v1495_v10  ;;  %v1330_v13 = vadd.f32 %v1298_v1, %v2752_v38  ;;  %v1507_v58 = vsel %vm78_vm0, %v1455_v56, 0.0  ;;  %vm1357_vm15 = vcmp.gt.f32.partialorder %v1325_v9, 0.0  ;;  %v1504_v5 = vsel %vm78_vm0, %v1454_v53, 0.0 }
 0x3c8   :  { %1493 = vadd.xlane.f32.xlu1 %v1492_v62  ;;  %v1391_v15 = vmul.f32 0.01, %v1327_v23  ;;  %vm1359_vm2 = vcmp.gt.f32.partialorder %v1327_v23, 0.0  ;;  %v1390_v24 = vmul.f32 0.01, %v1326_v33  ;;  %vm1358_vm14 = vcmp.gt.f32.partialorder %v1326_v33, 0.0 }
 0x3c9   :  { %v1329_v44 = vadd.f32 %v1297_v6, %v2797_v2  ;;  %v1501_v43 = vsel %vm78_vm0, %v1453_v60, 0.0  ;;  %v1328_v20 = vadd.f32 %v1296_v45, %v2752_v38  ;;  %v1421_v59 = vsel %vm1357_vm15, %v1325_v9, %v1389_v35 }
 0x3ca   :  { %v1423_v61 = vsel %vm1359_vm2, %v1327_v23, %v1391_v15  ;;  %v1422_v16 = vsel %vm1358_vm14, %v1326_v33, %v1390_v24  ;;  %v1394_v42 = vmul.f32 0.01, %v1330_v13  ;;  %vm1362_vm1 = vcmp.gt.f32.partialorder %v1330_v13, 0.0  ;;  %v1257_v54 = vpop.permute.xlu2 %1256 }
 0x3cb   :  { %v1458_v28 = vmul.f32 %v2840_v48, %v1423_v61  ;;  %v1457_v46 = vmul.f32 %v2840_v48, %v1422_v16  ;;  %v1456_v49 = vmul.f32 %v2840_v48, %v1421_v59  ;;  %v1393_v40 = vmul.f32 0.01, %v1329_v44 }
 0x3cc   :  { %v1299_v32 = vadd.f32 %v1251_v37, %v2808_v12  ;;  %vm1361_vm2 = vcmp.gt.f32.partialorder %v1329_v44, 0.0  ;;  %v1392_v36 = vmul.f32 0.01, %v1328_v20  ;;  %v1426_v34 = vsel %vm1362_vm1, %v1330_v13, %v1394_v42 }
 0x3cd   :  { %v1516_v55 = vsel %vm78_vm0, %v1458_v28, 0.0  ;;  %vm1360_vm14 = vcmp.gt.f32.partialorder %v1328_v20, 0.0  ;;  %v1513_v11 = vsel %vm78_vm0, %v1457_v46, 0.0  ;;  %v1510_v0 = vsel %vm78_vm0, %v1456_v49, 0.0  ;;  %v2929_v1 = vpop.f32.mrf.mxu3 }
 0x3ce   :  { %1508 = vadd.xlane.f32.xlu2 %v1507_v58  ;;  %v1425_v18 = vsel %vm1361_vm2, %v1329_v44, %v1393_v40  ;;  %v1331_v7 = vadd.f32 %v1299_v32, %v2797_v2  ;;  %v1461_v12 = vmul.f32 %v2840_v48, %v1426_v34  ;;  %v1424_v63 = vsel %vm1360_vm14, %v1328_v20, %v1392_v36 }
 0x3cf   :  { %1505 = vadd.xlane.f32.xlu0 %v1504_v5  ;;  %v1304_v27 = vadd.f32 %v1257_v54, %v2831_v41  ;;  %v1460_v10 = vmul.f32 %v2840_v48, %v1425_v18  ;;  %v1459_v37 = vmul.f32 %v2840_v48, %v1424_v63  ;;  %v1305_v60 = vadd.f32 %v1257_v54, %v2846_v52 }
 0x3d0   :  { %1502 = vadd.xlane.f32.xlu1 %v1501_v43  ;;  %v1525_v33 = vsel %vm78_vm0, %v1461_v12, 0.0  ;;  %vm1363_vm15 = vcmp.gt.f32.partialorder %v1331_v7, 0.0  ;;  %v1395_v62 = vmul.f32 0.01, %v1331_v7 }
 0x3d1   :  { %v1336_v41 = vadd.f32 %v1304_v27, %v2752_v38  ;;  %v1522_v3 = vsel %vm78_vm0, %v1460_v10, 0.0  ;;  %v1337_v52 = vadd.f32 %v1305_v60, %v2797_v2 }
 0x3d2   :  { %v1263_v36 = vpop.permute.xlu2 %1262 }
 0x3d3   :  { %v1400_v24 = vmul.f32 0.01, %v1336_v41  ;;  %vm1368_vm13 = vcmp.gt.f32.partialorder %v1336_v41, 0.0  ;;  %v1310_v12 = vadd.f32 %v1263_v36, %v2912_v30 }
 0x3d6   :  { %1517 = vadd.xlane.f32.xlu2 %v1516_v55  ;;  %v1196_v55 = vpop.f32.mrf.mxu3 }
 0x3d7   :  { %1514 = vadd.xlane.f32.xlu0 %v1513_v11  ;;  %v1401_v11 = vmul.f32 0.01, %v1337_v52 }
 0x3d8   :  { %1511 = vadd.xlane.f32.xlu1 %v1510_v0 }
 0x3dc   :  { %v1255_v23 = vpop.permute.xlu0 %1254  ;;  %v1253_v50 = vpop.permute.xlu1 %1252 }
 0x3dd   :  { %v1302_v26 = vadd.f32 %v1255_v23, %v2825_v14  ;;  %v1303_v51 = vadd.f32 %v1255_v23, %v2827_v17  ;;  %v1300_v9 = vadd.f32 %v1253_v50, %v2817_v21  ;;  %v1301_v4 = vadd.f32 %v1253_v50, %v2823_v39 }
 0x3de   :  { %1526 = vadd.xlane.f32.xlu2 %v1525_v33  ;;  %v1519_v14 = vsel %vm78_vm0, %v1459_v37, 0.0  ;;  %v1427_v39 = vsel %vm1363_vm15, %v1331_v7, %v1395_v62  ;;  %v1342_v62 = vadd.f32 %v1310_v12, %v2752_v38 }
 0x3df   :  { %v1335_v56 = vadd.f32 %v1303_v51, %v2797_v2  ;;  %v1332_v53 = vadd.f32 %v1300_v9, %v2752_v38  ;;  %v1333_v15 = vadd.f32 %v1301_v4, %v2797_v2  ;;  %1523 = vadd.xlane.f32.xlu0 %v1522_v3  ;;  %v1334_v21 = vadd.f32 %v1302_v26, %v2752_v38  ;;  %v1199_v4 = vpop.f32.mrf.mxu3 }
 0x3e0   :  { %1520 = vadd.xlane.f32.xlu1 %v1519_v14  ;;  %v1462_v45 = vmul.f32 %v2840_v48, %v1427_v39  ;;  %v1311_v51 = vadd.f32 %v1263_v36, %v2929_v1 }
 0x3e1   :  { %vm1364_vm1 = vcmp.gt.f32.partialorder %v1332_v53, 0.0  ;;  %v1396_v17 = vmul.f32 0.01, %v1332_v53  ;;  %vm1365_vm2 = vcmp.gt.f32.partialorder %v1333_v15, 0.0  ;;  %v1397_v6 = vmul.f32 0.01, %v1333_v15 }
 0x3e2   :  { %v1399_v58 = vmul.f32 0.01, %v1335_v56  ;;  %v1398_v43 = vmul.f32 0.01, %v1334_v21  ;;  %vm1367_vm14 = vcmp.gt.f32.partialorder %v1335_v56, 0.0  ;;  %vm1366_vm15 = vcmp.gt.f32.partialorder %v1334_v21, 0.0 }
 0x3e3   :  { %v1428_v35 = vsel %vm1364_vm1, %v1332_v53, %v1396_v17  ;;  %v1429_v13 = vsel %vm1365_vm2, %v1333_v15, %v1397_v6  ;;  %v1528_v46 = vsel %vm78_vm0, %v1462_v45, 0.0  ;;  %vm1369_vm1 = vcmp.gt.f32.partialorder %v1337_v52, 0.0 }
 0x3e4   :  { %v1259_v5 = vpop.permute.xlu1 %1258  ;;  %v1463_v61 = vmul.f32 %v2840_v48, %v1428_v35  ;;  %v1464_v44 = vmul.f32 %v2840_v48, %v1429_v13  ;;  %v1431_v49 = vsel %vm1367_vm14, %v1335_v56, %v1399_v58  ;;  %v1261_v40 = vpop.permute.xlu0 %1260  ;;  %v1433_v37 = vsel %vm1369_vm1, %v1337_v52, %v1401_v11 }
 0x3e5   :  { %v1306_v16 = vadd.f32 %v1259_v5, %v2852_v25  ;;  %v1307_v20 = vadd.f32 %v1259_v5, %v2864_v8  ;;  %v1430_v25 = vsel %vm1366_vm15, %v1334_v21, %v1398_v43  ;;  %v1432_v8 = vsel %vm1368_vm13, %v1336_v41, %v1400_v24 }
 0x3e6   :  { %v1531_v59 = vsel %vm78_vm0, %v1463_v61, 0.0  ;;  %v1534_v28 = vsel %vm78_vm0, %v1464_v44, 0.0  ;;  %v1466_v34 = vmul.f32 %v2840_v48, %v1431_v49  ;;  %v1309_v54 = vadd.f32 %v1261_v40, %v2898_v29 }
 0x3e7   :  { %v1338_v42 = vadd.f32 %v1306_v16, %v2752_v38  ;;  %1532 = vadd.xlane.f32.xlu0 %v1531_v59  ;;  %v1339_v32 = vadd.f32 %v1307_v20, %v2797_v2  ;;  %1535 = vadd.xlane.f32.xlu2 %v1534_v28  ;;  %v1465_v0 = vmul.f32 %v2840_v48, %v1430_v25  ;;  %v1406_v21 = vmul.f32 0.01, %v1342_v62 }
 0x3e8   :  { %1529 = vadd.xlane.f32.xlu1 %v1528_v46  ;;  %v1467_v18 = vmul.f32 %v2840_v48, %v1432_v8  ;;  %v1308_v63 = vadd.f32 %v1261_v40, %v2882_v31  ;;  %v1540_v10 = vsel %vm78_vm0, %v1466_v34, 0.0  ;;  %v1341_v23 = vadd.f32 %v1309_v54, %v2797_v2 }
 0x3e9   :  { %v1402_v7 = vmul.f32 0.01, %v1338_v42  ;;  %vm1370_vm2 = vcmp.gt.f32.partialorder %v1338_v42, 0.0  ;;  %v1403_v27 = vmul.f32 0.01, %v1339_v32  ;;  %vm1371_vm13 = vcmp.gt.f32.partialorder %v1339_v32, 0.0 }
 0x3ea   :  { %v1537_v50 = vsel %vm78_vm0, %v1465_v0, 0.0  ;;  %v1543_v29 = vsel %vm78_vm0, %v1467_v18, 0.0  ;;  %v1340_v30 = vadd.f32 %v1308_v63, %v2752_v38  ;;  %v1468_v3 = vmul.f32 %v2840_v48, %v1433_v37 }
 0x3eb   :  { %v1434_v33 = vsel %vm1370_vm2, %v1338_v42, %v1402_v7  ;;  %v1435_v31 = vsel %vm1371_vm13, %v1339_v32, %v1403_v27  ;;  %v1405_v53 = vmul.f32 0.01, %v1341_v23  ;;  %vm1373_vm14 = vcmp.gt.f32.partialorder %v1341_v23, 0.0 }
 0x3ec   :  { %v1265_v26 = vpop.permute.xlu1 %1264  ;;  %v1469_v9 = vmul.f32 %v2840_v48, %v1434_v33  ;;  %v1470_v56 = vmul.f32 %v2840_v48, %v1435_v31  ;;  %v1404_v14 = vmul.f32 0.01, %v1340_v30  ;;  %vm1372_vm15 = vcmp.gt.f32.partialorder %v1340_v30, 0.0 }
 0x3ed   :  { %v1312_v41 = vadd.f32 %v1265_v26, %v1196_v55  ;;  %v1313_v15 = vadd.f32 %v1265_v26, %v1199_v4  ;;  %vm1374_vm1 = vcmp.gt.f32.partialorder %v1342_v62, 0.0  ;;  %v1343_v39 = vadd.f32 %v1311_v51, %v2797_v2 }
 0x3ee   :  { %v1549_v17 = vsel %vm78_vm0, %v1469_v9, 0.0  ;;  %v1546_v6 = vsel %vm78_vm0, %v1468_v3, 0.0  ;;  %v1552_v60 = vsel %vm78_vm0, %v1470_v56, 0.0  ;;  %v1437_v24 = vsel %vm1373_vm14, %v1341_v23, %v1405_v53 }
 0x3ef   :  { %1541 = vadd.xlane.f32.xlu0 %v1540_v10  ;;  %1544 = vadd.xlane.f32.xlu2 %v1543_v29  ;;  %v1344_v1 = vadd.f32 %v1312_v41, %v2752_v38  ;;  %v1345_v45 = vadd.f32 %v1313_v15, %v2797_v2  ;;  %v1436_v35 = vsel %vm1372_vm15, %v1340_v30, %v1404_v14  ;;  %v1407_v43 = vmul.f32 0.01, %v1343_v39 }
 0x3f0   :  { %1538 = vadd.xlane.f32.xlu1 %v1537_v50  ;;  %v1438_v13 = vsel %vm1374_vm1, %v1342_v62, %v1406_v21  ;;  %v1472_v58 = vmul.f32 %v2840_v48, %v1437_v24  ;;  %v1471_v5 = vmul.f32 %v2840_v48, %v1436_v35  ;;  %vm1375_vm13 = vcmp.gt.f32.partialorder %v1343_v39, 0.0 }
 0x3f1   :  { %v1473_v61 = vmul.f32 %v2840_v48, %v1438_v13  ;;  %v1408_v44 = vmul.f32 0.01, %v1344_v1  ;;  %vm1376_vm2 = vcmp.gt.f32.partialorder %v1344_v1, 0.0  ;;  %v1409_v16 = vmul.f32 0.01, %v1345_v45 }
 0x3f2   :  { %vm1377_vm12 = vcmp.gt.f32.partialorder %v1345_v45, 0.0  ;;  %v1558_v20 = vsel %vm78_vm0, %v1472_v58, 0.0  ;;  %v1555_v52 = vsel %vm78_vm0, %v1471_v5, 0.0  ;;  %v1439_v42 = vsel %vm1375_vm13, %v1343_v39, %v1407_v43 }
 0x3f3   :  { %v1561_v59 = vsel %vm78_vm0, %v1473_v61, 0.0  ;;  %v1440_v28 = vsel %vm1376_vm2, %v1344_v1, %v1408_v44  ;;  %v1441_v46 = vsel %vm1377_vm12, %v1345_v45, %v1409_v16  ;;  %v1474_v40 = vmul.f32 %v2840_v48, %v1439_v42 }
 0x3f4   :  { %v1475_v49 = vmul.f32 %v2840_v48, %v1440_v28  ;;  %v1476_v32 = vmul.f32 %v2840_v48, %v1441_v46  ;;  %v1872_v55 = vpack.i.bf16 %v2752_v38, %v2797_v2  ;;  %vm3087_vm12 = vcmask 130048  }
 0x3f5   :  { %v1564_v8 = vsel %vm78_vm0, %v1474_v40, 0.0 }
 0x3f6   :  { %v1567_v25 = vsel %vm78_vm0, %v1475_v49, 0.0  ;;  %v1570_v36 = vsel %vm78_vm0, %v1476_v32, 0.0 }
 0x3f7   :  { %1550 = vadd.xlane.f32.xlu0 %v1549_v17  ;;  %1553 = vadd.xlane.f32.xlu2 %v1552_v60 }
 0x3f8   :  { %1547 = vadd.xlane.f32.xlu1 %v1546_v6 }
 0x3ff   :  { %1559 = vadd.xlane.f32.xlu0 %v1558_v20  ;;  %1562 = vadd.xlane.f32.xlu2 %v1561_v59 }
 0x400   :  { %1556 = vadd.xlane.f32.xlu1 %v1555_v52 }
 0x407   :  { %1568 = vadd.xlane.f32.xlu0 %v1567_v25  ;;  %1571 = vadd.xlane.f32.xlu2 %v1570_v36 }
 0x408   :  { %1565 = vadd.xlane.f32.xlu1 %v1564_v8 }
 0x417   :  { %v1482_v34 = vpop.xlane.xlu2 %1481  ;;  %v1479_v11 = vpop.xlane.xlu0 %1478 }
 0x418   :  { %v1606_v38 = vperm.slane %v1482_v34, %v2465_v22  ;;  %v1605_v2 = vperm.slane %v1479_v11, %v2462_v19 }
 0x41a   :  { %v1607_v3 = vsel %vm727_vm3, %v1606_v38, %v1605_v2 }
 0x41f   :  { %1873 = vrot.lane.b32.xlu2 %v1872_v55, %s1960_s5 }
 0x431   :  { %v1491_v54 = vpop.xlane.xlu2 %1490 }
 0x432   :  { %v1488_v0 = vpop.xlane.xlu0 %1487  ;;  %v1611_v29 = vperm.slane %v1491_v54, %v2462_v19 }
 0x433   :  { %v1485_v18 = vpop.xlane.xlu1 %1484  ;;  %v1609_v37 = vperm.slane %v1488_v0, %v2465_v22 }
 0x434   :  { %v1608_v23 = vperm.slane %v1485_v18, %v2462_v19 }
 0x436   :  { %v1610_v62 = vsel %vm727_vm3, %v1609_v37, %v1608_v23 }
 0x437   :  { %v1653_v53 = vsel %vm774_vm4, %v1610_v62, %v1607_v3 }
 0x439   :  { %v1500_v48 = vpop.xlane.xlu2 %1499 }
 0x43a   :  { %v1497_v7 = vpop.xlane.xlu0 %1496  ;;  %v1615_v30 = vperm.slane %v1500_v48, %v2465_v22 }
 0x43b   :  { %v1494_v12 = vpop.xlane.xlu1 %1493  ;;  %v1614_v26 = vperm.slane %v1497_v7, %v2462_v19 }
 0x43c   :  { %v1612_v50 = vperm.slane %v1494_v12, %v2465_v22 }
 0x43d   :  { %v1616_v15 = vsel %vm727_vm3, %v1615_v30, %v1614_v26 }
 0x43e   :  { %v1613_v51 = vsel %vm727_vm3, %v1612_v50, %v1611_v29 }
 0x43f   :  { %v1654_v14 = vsel %vm776_vm5, %v1613_v51, %v1653_v53 }
 0x440   :  { %v1655_v60 = vsel %vm778_vm6, %v1616_v15, %v1654_v14 }
 0x441   :  { %v1509_v63 = vpop.xlane.xlu2 %1508 }
 0x442   :  { %v1506_v27 = vpop.xlane.xlu0 %1505  ;;  %v1620_v21 = vperm.slane %v1509_v63, %v2462_v19 }
 0x443   :  { %v1503_v10 = vpop.xlane.xlu1 %1502  ;;  %v1618_v9 = vperm.slane %v1506_v27, %v2465_v22 }
 0x444   :  { %v1617_v4 = vperm.slane %v1503_v10, %v2462_v19 }
 0x446   :  { %v1619_v39 = vsel %vm727_vm3, %v1618_v9, %v1617_v4 }
 0x447   :  { %v1656_v45 = vsel %vm780_vm7, %v1619_v39, %v1655_v60 }
 0x449   :  { %v1518_v33 = vpop.xlane.xlu2 %1517 }
 0x44a   :  { %v1515_v31 = vpop.xlane.xlu0 %1514  ;;  %v1624_v17 = vperm.slane %v1518_v33, %v2465_v22 }
 0x44b   :  { %v1512_v41 = vpop.xlane.xlu1 %1511  ;;  %v1623_v1 = vperm.slane %v1515_v31, %v2462_v19 }
 0x44c   :  { %v1621_v56 = vperm.slane %v1512_v41, %v2465_v22 }
 0x44d   :  { %v1625_v13 = vsel %vm727_vm3, %v1624_v17, %v1623_v1 }
 0x44e   :  { %v1622_v6 = vsel %vm727_vm3, %v1621_v56, %v1620_v21 }
 0x44f   :  { %v1657_v61 = vsel %vm782_vm8, %v1622_v6, %v1656_v45 }
 0x450   :  { %v1658_v16 = vsel %vm784_vm9, %v1625_v13, %v1657_v61 }
 0x451   :  { %v1527_v24 = vpop.xlane.xlu2 %1526 }
 0x452   :  { %v1524_v35 = vpop.xlane.xlu0 %1523  ;;  %v1629_v18 = vperm.slane %v1527_v24, %v2462_v19 }
 0x453   :  { %v1627_v58 = vperm.slane %v1524_v35, %v2465_v22  ;;  %v1521_v5 = vpop.xlane.xlu1 %1520 }
 0x454   :  { %v1626_v44 = vperm.slane %v1521_v5, %v2462_v19  ;;  %v1929_v5 = vld [vmem:[%s3077_s2] sm:$0xff] }
 0x456   :  { %v1628_v43 = vsel %vm727_vm3, %v1627_v58, %v1626_v44 }
 0x457   :  { %v1659_v20 = vsel %vm786_vm10, %v1628_v43, %v1658_v16 }
 0x458   :  { %v1669_v52 = vsel %vm688_vm11, %v1659_v20, -1e+30 }
 0x459   :  { %v1671_v59 = vsel %vm3087_vm12, %v1669_v52, -inf }
 0x45a   :  { %1672 = vmax.xlane.f32.xlu1 %v1671_v59  ;;  %v1533_v28 = vpop.xlane.xlu0 %1532  ;;  %v1536_v46 = vpop.xlane.xlu2 %1535 }
 0x45b   :  { %v1530_v42 = vpop.xlane.xlu1 %1529  ;;  %v1632_v34 = vperm.slane %v1533_v28, %v2462_v19  ;;  %v1633_v11 = vperm.slane %v1536_v46, %v2465_v22 }
 0x45c   :  { %v1630_v55 = vperm.slane %v1530_v42, %v2465_v22 }
 0x45d   :  { %v1634_v27 = vsel %vm727_vm3, %v1633_v11, %v1632_v34 }
 0x45e   :  { %v1631_v63 = vsel %vm727_vm3, %v1630_v55, %v1629_v18  ;;  %v1931_v18 = vld [vmem:[%s3075_s0] sm:$0xff] }
 0x45f   :  { %v1660_v33 = vsel %vm774_vm4, %v1634_v27, %v1631_v63  ;;  %vm3088_vm4 = vcmp.gt.f32.partialorder %v2536_v47, 0.0 }
 0x462   :  { %v1542_v49 = vpop.xlane.xlu0 %1541  ;;  %v1545_v32 = vpop.xlane.xlu2 %1544 }
 0x463   :  { %v1539_v40 = vpop.xlane.xlu1 %1538  ;;  %v1636_v54 = vperm.slane %v1542_v49, %v2465_v22  ;;  %v1638_v10 = vperm.slane %v1545_v32, %v2462_v19 }
 0x464   :  { %v1635_v57 = vperm.slane %v1539_v40, %v2462_v19 }
 0x466   :  { %v1637_v37 = vsel %vm727_vm3, %v1636_v54, %v1635_v57 }
 0x467   :  { %v1661_v62 = vsel %vm776_vm5, %v1637_v37, %v1660_v33  ;;  %vm3089_vm5 = vmmov %vm3087_vm12 }
 0x46a   :  { %v1551_v25 = vpop.xlane.xlu0 %1550  ;;  %v1554_v36 = vpop.xlane.xlu2 %1553 }
 0x46b   :  { %v1548_v8 = vpop.xlane.xlu1 %1547  ;;  %v1641_v23 = vperm.slane %v1551_v25, %v2462_v19  ;;  %v1642_v50 = vperm.slane %v1554_v36, %v2465_v22 }
 0x46c   :  { %v1639_v48 = vperm.slane %v1548_v8, %v2465_v22 }
 0x46d   :  { %v1643_v26 = vsel %vm727_vm3, %v1642_v50, %v1641_v23 }
 0x46e   :  { %v1640_v38 = vsel %vm727_vm3, %v1639_v48, %v1638_v10 }
 0x46f   :  { %v1662_v30 = vsel %vm778_vm6, %v1640_v38, %v1661_v62 }
 0x470   :  { %v1663_v15 = vsel %vm780_vm7, %v1643_v26, %v1662_v30  ;;  %v1932_v26 = vld [vmem:[%s3075_s0 + $0x8] sm:$0xff] }
 0x472   :  { %v1560_v0 = vpop.xlane.xlu0 %1559  ;;  %v1563_v12 = vpop.xlane.xlu2 %1562 }
 0x473   :  { %v1557_v7 = vpop.xlane.xlu1 %1556  ;;  %v1645_v29 = vperm.slane %v1560_v0, %v2465_v22  ;;  %v1647_v3 = vperm.slane %v1563_v12, %v2462_v19 }
 0x474   :  { %v1644_v2 = vperm.slane %v1557_v7, %v2462_v19 }
 0x476   :  { %v1646_v51 = vsel %vm727_vm3, %v1645_v29, %v1644_v2 }
 0x477   :  { %v1664_v39 = vsel %vm782_vm8, %v1646_v51, %v1663_v15 }
 0x47a   :  { %v1569_v31 = vpop.xlane.xlu0 %1568  ;;  %v1572_v41 = vpop.xlane.xlu2 %1571 }
 0x47b   :  { %v1566_v9 = vpop.xlane.xlu1 %1565  ;;  %v1650_v4 = vperm.slane %v1569_v31, %v2462_v19  ;;  %v1651_v53 = vperm.slane %v1572_v41, %v2465_v22 }
 0x47c   :  { %v1648_v56 = vperm.slane %v1566_v9, %v2465_v22 }
 0x47d   :  { %v1652_v21 = vsel %vm727_vm3, %v1651_v53, %v1650_v4 }
 0x47e   :  { %v1649_v14 = vsel %vm727_vm3, %v1648_v56, %v1647_v3  ;;  %vm3090_vm3 = vmmov %vm3089_vm5 }
 0x47f   :  { %v1665_v17 = vsel %vm784_vm9, %v1649_v14, %v1664_v39  ;;  %vm3091_vm6 = vmmov %vm3090_vm3 }
 0x480   :  { %v1666_v1 = vsel %vm786_vm10, %v1652_v21, %v1665_v17  ;;  %vm3092_vm7 = vmmov %vm3090_vm3 }
 0x481   :  { %v1670_v6 = vsel %vm3088_vm4, %v1666_v1, -1e+30  ;;  %vm3093_vm8 = vmmov %vm3090_vm3 }
 0x482   :  { %v1674_v19 = vsel %vm3089_vm5, %v1670_v6, -inf  ;;  %v1874_v60 = vpop.permute.xlu2 %1873 }
 0x483   :  { %1675 = vmax.xlane.f32.xlu0 %v1674_v19  ;;  %v1875_v22 = vunpack.i.l.bf16 %v1874_v60  ;;  %v1876_v24 = vunpack.i.h.bf16 %v1874_v60 }
 0x485   :  { %1719 = vmatpush.msra.mxu0 %v1875_v22 }
 0x487   :  { %1720 = vmatpush.msra.mxu0 %v1876_v24 }
 0x4cd   :  { %v1673_v45 = vpop.xlane.xlu1 %1672 }
 0x4ce   :  { %v1677_v35 = vsub.f32 %v1669_v52, %v1673_v45  ;;  %v1930_v52 = vld [vmem:[%s3077_s2 + $0x8] sm:$0xff] }
 0x4d0   :  { %v1679_v13 = vmul.f32 1.442695, %v1677_v35 }
 0x4d2   :  { %1887 = vpow2.f32 %v1679_v13 }
 0x4d8   :  { %v1888_v58 = vpop.eup %1887 }
 0x4d9   :  { %v1683_v61 = vmul.f32 %v1929_v5, %v1888_v58 }
 0x4db   :  { %1850 = vmatmul.msk.f32.vlgmr.msra.gmra.mxu0 %vm3090_vm3, %v1683_v61  ;;  %v1685_v47 = vsel %vm3091_vm6, %v1683_v61, 0.0 }
 0x4dc   :  { %1686 = vadd.xlane.f32.xlu1 %v1685_v47 }
 0x4f6   :  { %v1676_v44 = vpop.xlane.xlu0 %1675 }
 0x4f7   :  { %v1678_v43 = vsub.f32 %v1670_v6, %v1676_v44 }
 0x4f9   :  { %v1681_v16 = vmul.f32 1.442695, %v1678_v43 }
 0x4fb   :  { %1889 = vpow2.f32 %v1681_v16 }
 0x501   :  { %v1890_v20 = vpop.eup %1889 }
 0x502   :  { %v1684_v59 = vmul.f32 %v1930_v52, %v1890_v20 }
 0x504   :  { %1851 = vmatmul.msk.f32.gmra.mxu0 %vm3092_vm7, %v1684_v59  ;;  %v1688_v28 = vsel %vm3093_vm8, %v1684_v59, 0.0 }
 0x505   :  { %1689 = vadd.xlane.f32.xlu0 %v1688_v28 }
 0x54f   :  { %v1687_v42 = vpop.xlane.xlu1 %1686 }
 0x550   :  { %v1691_v46 = vmax.f32 %v1687_v42, 1e-20 }
 0x552   :  { %1891 = vrcp.f32 %v1691_v46  ;;  %v1739_v25 = vand.u32 2147483648, %v1691_v46  ;;  %v1737_v36 = vand.u32 2147483647, %v1691_v46  ;;  %vm1733_vm10 = vweird.f32 %v1691_v46 }
 0x554   :  { %v1740_v34 = vor.u32 1.1754944e-38, %v1739_v25  ;;  %vm1738_vm14 = vcmp.eq.f32.partialorder %v1737_v36, 8.507059e+37 }
 0x558   :  { %v1892_v49 = vpop.eup %1891  ;;  %v1722_v57 = vpop.f32.mrf.mxu0 }
 0x559   :  { %v1729_v40 = vmul.f32 %v1892_v49, %v1691_v46  ;;  %vm1734_vm9 = vweird.f32 %v1892_v49 }
 0x55a   :  { %vm1735_vm11 = vmor %vm1733_vm10, %vm1734_vm9 }
 0x55b   :  { %v1730_v32 = vsub.f32 1.0, %v1729_v40 }
 0x55d   :  { %v1731_v8 = vmul.f32 %v1892_v49, %v1730_v32 }
 0x55f   :  { %v1732_v55 = vadd.f32 %v1892_v49, %v1731_v8 }
 0x561   :  { %v1736_v11 = vsel %vm1735_vm11, %v1892_v49, %v1732_v55 }
 0x562   :  { %v1741_v54 = vsel %vm1738_vm14, %v1740_v34, %v1736_v11 }
 0x563   :  { %v1742_v0 = vmul.f32 %v1741_v54, %v1722_v57 }
 0x565   :  { %v1758_v48 = vadd.f32 %v1931_v18, %v1742_v0 }
 0x567   :  { %1760 = vst.msk [vmem:[#allocation2] sm:$0xff] %vm78_vm0, %v1758_v48 }
 0x578   :  { %v1690_v7 = vpop.xlane.xlu0 %1689 }
 0x579   :  { %v1692_v12 = vmax.f32 %v1690_v7, 1e-20 }
 0x57b   :  { %1893 = vrcp.f32 %v1692_v12  ;;  %v1754_v37 = vand.u32 2147483648, %v1692_v12  ;;  %v1752_v50 = vand.u32 2147483647, %v1692_v12  ;;  %vm1748_vm1 = vweird.f32 %v1692_v12 }
 0x57d   :  { %v1755_v2 = vor.u32 1.1754944e-38, %v1754_v37  ;;  %vm1753_vm13 = vcmp.eq.f32.partialorder %v1752_v50, 8.507059e+37 }
 0x581   :  { %v1894_v63 = vpop.eup %1893  ;;  %v1725_v33 = vpop.f32.mrf.mxu0 }
 0x582   :  { %v1744_v27 = vmul.f32 %v1894_v63, %v1692_v12  ;;  %vm1749_vm15 = vweird.f32 %v1894_v63 }
 0x583   :  { %vm1750_vm2 = vmor %vm1748_vm1, %vm1749_vm15 }
 0x584   :  { %v1745_v10 = vsub.f32 1.0, %v1744_v27 }
 0x586   :  { %v1746_v23 = vmul.f32 %v1894_v63, %v1745_v10 }
 0x588   :  { %v1747_v38 = vadd.f32 %v1894_v63, %v1746_v23 }
 0x58a   :  { %v1751_v29 = vsel %vm1750_vm2, %v1894_v63, %v1747_v38 }
 0x58b   :  { %v1756_v62 = vsel %vm1753_vm13, %v1755_v2, %v1751_v29 }
 0x58c   :  { %v1757_v30 = vmul.f32 %v1756_v62, %v1725_v33 }
 0x58e   :  { %v1759_v31 = vadd.f32 %v1932_v26, %v1757_v30 }
 0x590   :  { %1761 = vst.msk [vmem:[#allocation2 + $0x8] sm:$0xff] %vm78_vm0, %v1759_v31 }
 0x591   :  { %1774 = dma.vmem_to_hbm [thread:$0]  %s1767_s25, 256, %s1769_s28, [#allocation3], %s1962_s6, %s1962_s6, %s1963_s4  }
 0x592   :  { %1957 = dma.done.wait [#allocation3], 256  }
 0x593   :  { %1958 = vsyncadd [#allocation3], 4294967040 }
 0x594   :  { %1779 = vsyncpa [#allocation3], 1 }

</bundles_post_ra>
